<compile_context>
chip_gen: v6e
topology: v6e:2x2x1
jax: 0.10.0
libtpu: 0.0.40
codegen_flags: <defaults>
</compile_context>

<pallas_src>
import functools

import jax
import jax.numpy as jnp
from jax.experimental import pallas as pl
from jax.experimental.pallas import tpu as pltpu

LANE = 128
SUBLANE_BF16 = 16   # bf16 min tile is (16, 128)


def _round_up(v, m):
    return (v + m - 1) // m * m


# --------------------------------------------------------------------------
# Kernel
# --------------------------------------------------------------------------
def gin_kernel(x_ref, ahat_ref, pool_ref, w_ref, b_ref, out_ref, *,
               num_classes, cp):
    """Fused GIN forward.

    x_ref    [NP, CP]     bf16  node features (zero padded)
    ahat_ref [NP, NP]     bf16  (1+eps)*I + A^T  (eps = 0, self-loops folded in)
    pool_ref [GP, NP]     bf16  one-hot pooling matrix
    w_ref    [9, CP, CP]  bf16  stacked weights (w1a,w1b,...,w4b,wl), zero padded
    b_ref    [9, 1,  CP]  f32   stacked biases, zero padded
    out_ref  [GP, 2*CP]   f32   lanes [:CP] = pooled hG, lanes [CP:] = log_softmax
    """

    def linear(h_bf16, idx):
        acc = jnp.dot(h_bf16, w_ref[idx], preferred_element_type=jnp.float32)
        return acc + b_ref[idx]

    def gin_conv(h_bf16, layer):
        # GINConv: MLP((1+eps)*h_i + sum_{j->i} h_j) == MLP(Ahat @ H)
        # TODO(synk): PyG MLP's default BatchNorm is omitted (identity at init).
        agg = jnp.dot(ahat_ref[...], h_bf16, preferred_element_type=jnp.float32)
        z = jnp.maximum(linear(agg.astype(jnp.bfloat16), 2 * layer), 0.0)
        return linear(z.astype(jnp.bfloat16), 2 * layer + 1)

    h = gin_conv(x_ref[...], 0)
    h = gin_conv(jnp.maximum(h, 0.0).astype(jnp.bfloat16), 1)
    h = gin_conv(jnp.maximum(h, 0.0).astype(jnp.bfloat16), 2)
    h = gin_conv(jnp.maximum(h, 0.0).astype(jnp.bfloat16), 3)

    # global_add_pool: hG[g] = sum_{i: batch[i]==g} h[i] == P @ H
    hG = jnp.dot(pool_ref[...], h.astype(jnp.bfloat16),
                 preferred_element_type=jnp.float32)

    # F.dropout(p=0.5) is identity in eval mode.
    # TODO(synk): training-mode dropout would use pltpu.prng_seed/prng_random_bits.
    logits = linear(hG.astype(jnp.bfloat16), 8)

    # Mask padded class lanes so they contribute exp() == 0 to the softmax.
    lane = jax.lax.broadcasted_iota(jnp.int32, logits.shape, 1)
    logits = jnp.where(lane < num_classes, logits, jnp.float32(-1e30))
    m = jnp.max(logits, axis=1, keepdims=True)
    z = logits - m
    lse = jnp.log(jnp.sum(jnp.exp(z), axis=1, keepdims=True))

    # Single wide lane-dense store: [GP, 2*CP] = [hG | log_softmax].
    out_ref[...] = jnp.concatenate([hG, z - lse], axis=1)


# --------------------------------------------------------------------------
# One-time parameter packing (hoisted out of the per-call forward path).
# --------------------------------------------------------------------------
def pack_params(params, in_channels, hidden, out_channels):
    """params: flat tuple (w1a,b1a,w1b,b1b, ..., w4a,b4a,w4b,b4b, wl, bl).

    Returns (W:[9,CP,CP] bf16, B:[9,1,CP] f32).  Call once; reuse across calls.
    """
    # TODO(synk): if hidden/out ever exceed 128, pad CP to multiples of 256 on
    # v6e/v7x (2x256x256 MXU) but keep 128 on v5e; at hidden=32 stay at 128.
    CP = _round_up(max(in_channels, hidden, out_channels, LANE), LANE)

    def pad_w(w):
        return jnp.pad(w, ((0, CP - w.shape[0]), (0, CP - w.shape[1])))

    def pad_b(b):
        return jnp.pad(b.reshape(1, -1), ((0, 0), (0, CP - b.shape[-1])))

    W = jnp.stack([pad_w(w) for w in params[0::2]]).astype(jnp.bfloat16)  # [9,CP,CP]
    B = jnp.stack([pad_b(b) for b in params[1::2]]).astype(jnp.float32)   # [9,1,CP]
    return W, B


def _vmem_budget_bytes(NP, CP, GP):
    est = (NP * CP * 2          # x
           + NP * NP * 2        # ahat
           + GP * NP * 2        # pool
           + 9 * CP * CP * 2    # W
           + 9 * 8 * CP * 4     # B (sublane padded)
           + GP * 2 * CP * 4    # fused output slab
           + 6 * NP * CP * 4)   # f32 intermediates headroom
    return min(max(2 * est + (1 << 20), 16 << 20), 64 << 20)


# --------------------------------------------------------------------------
# Forward wrapper (jitted; W/B already packed)
# --------------------------------------------------------------------------
@functools.partial(jax.jit,
                   static_argnames=("num_graphs", "hidden", "out_channels"))
def gin_forward(x, edge_index, batch, W, B, *, num_graphs, hidden,
                out_channels):
    n, in_ch = x.shape
    CP = W.shape[1]

    NP = _round_up(n, LANE)                       # node dim (MXU K/N)
    GP = _round_up(num_graphs, SUBLANE_BF16)      # graph dim (bf16 sublanes)

    src = edge_index[0].astype(jnp.int32)
    dst = edge_index[1].astype(jnp.int32)
    # Fold self-loops ((1+eps)*I, eps=0) into the edge list instead of eye(NP).
    loops = jnp.arange(n, dtype=jnp.int32)
    src_all = jnp.concatenate([src, loops])
    dst_all = jnp.concatenate([dst, loops])

    node_ids = jnp.arange(NP, dtype=jnp.int32)
    # Ahat built with a bf16 one-hot matmul (MXU) -> f32 accumulate -> bf16.
    src_oh = (src_all[:, None] == node_ids[None, :]).astype(jnp.bfloat16)  # [E+n, NP]
    dst_oh = (dst_all[:, None] == node_ids[None, :]).astype(jnp.bfloat16)  # [E+n, NP]
    ahat = jnp.dot(dst_oh.T, src_oh,
                   preferred_element_type=jnp.float32).astype(jnp.bfloat16)  # [NP, NP]

    batch_p = jnp.pad(batch.astype(jnp.int32), (0, NP - n), constant_values=-1)
    pool = (jnp.arange(GP, dtype=jnp.int32)[:, None] == batch_p[None, :]
            ).astype(jnp.bfloat16)                                          # [GP, NP]

    x_p = jnp.pad(x, ((0, NP - n), (0, CP - in_ch))).astype(jnp.bfloat16)

    vmem = pl.BlockSpec(memory_space=pltpu.MemorySpace.VMEM)
    kernel = functools.partial(gin_kernel, num_classes=out_channels, cp=CP)

    out = pl.pallas_call(
        kernel,
        out_shape=jax.ShapeDtypeStruct((GP, 2 * CP), jnp.float32),
        in_specs=[vmem] * 5,
        out_specs=vmem,
        compiler_params=pltpu.CompilerParams(
            vmem_limit_bytes=_vmem_budget_bytes(NP, CP, GP)),
    )(x_p, ahat, pool, W, B)

    hg = out[:num_graphs, :hidden]
    log_probs = out[:num_graphs, CP:CP + out_channels]
    return hg, log_probs


# --------------------------------------------------------------------------
# Pure-JAX f32 reference mirroring the torch module.
# --------------------------------------------------------------------------
def _reference(x, edge_index, batch, params, num_graphs):
    n = x.shape[0]
    src, dst = edge_index[0], edge_index[1]
    adj = jnp.zeros((n, n), jnp.float32).at[dst, src].add(1.0)
    ahat = adj + jnp.eye(n, dtype=jnp.float32)
    pool = (batch[None, :] == jnp.arange(num_graphs)[:, None]).astype(jnp.float32)

    (w1a, b1a, w1b, b1b, w2a, b2a, w2b, b2b,
     w3a, b3a, w3b, b3b, w4a, b4a, w4b, b4b, wl, bl) = params

    def mlp(h, wa, ba, wb, bb):
        return jnp.maximum(h @ wa + ba, 0.0) @ wb + bb

    h = jnp.maximum(mlp(ahat @ x, w1a, b1a, w1b, b1b), 0.0)
    h = jnp.maximum(mlp(ahat @ h, w2a, b2a, w2b, b2b), 0.0)
    h = jnp.maximum(mlp(ahat @ h, w3a, b3a, w3b, b3b), 0.0)
    h = mlp(ahat @ h, w4a, b4a, w4b, b4b)
    hg = pool @ h
    logits = hg @ wl + bl
    return hg, jax.nn.log_softmax(logits, axis=1)


def init_params(key, in_channels, hidden, out_channels):
    dims = [(in_channels, hidden), (hidden, hidden)]
    params = []
    for _ in range(4):  # conv1..conv4 MLPs
        for (di, do) in dims:
            key, k = jax.random.split(key)
            params.append(jax.random.normal(k, (di, do), jnp.float32) * 0.1)
            params.append(jnp.zeros((1, do), jnp.float32))
        dims = [(hidden, hidden), (hidden, hidden)]
    key, k = jax.random.split(key)
    params.append(jax.random.normal(k, (hidden, out_channels), jnp.float32) * 0.1)
    params.append(jnp.zeros((1, out_channels), jnp.float32))
    return tuple(params)


if __name__ == "__main__":
    IN_CH, HIDDEN, OUT_CH = 8, 32, 8
    N_NODES, N_EDGES, N_GRAPHS = 32, 96, 2

    key = jax.random.PRNGKey(0)
    key, kx, ks0, kd0, ks1, kd1 = jax.random.split(key, 6)

    x = jax.random.normal(kx, (N_NODES, IN_CH), jnp.float32)
    # two graphs of 16 nodes each; edges stay within their graph
    half = N_EDGES // 2
    src = jnp.concatenate([
        jax.random.randint(ks0, (half,), 0, 16),
        jax.random.randint(ks1, (half,), 16, 32),
    ])
    dst = jnp.concatenate([
        jax.random.randint(kd0, (half,), 0, 16),
        jax.random.randint(kd1, (half,), 16, 32),
    ])
    edge_index = jnp.stack([src, dst]).astype(jnp.int32)
    batch = jnp.concatenate([jnp.zeros(16, jnp.int32), jnp.ones(16, jnp.int32)])

    params = init_params(key, IN_CH, HIDDEN, OUT_CH)

    # One-time parameter packing (hoisted out of the forward path).
    W, B = pack_params(params, IN_CH, HIDDEN, OUT_CH)
    jax.block_until_ready((W, B))

    hg, log_probs = gin_forward(x, edge_index, batch, W, B,
                                num_graphs=N_GRAPHS, hidden=HIDDEN,
                                out_channels=OUT_CH)
    jax.block_until_ready((hg, log_probs))

    hg_ref, lp_ref = _reference(x, edge_index, batch, params, N_GRAPHS)
    # bf16 MXU operands (f32 accumulation) vs f32 reference -> relaxed tolerance
    assert jnp.allclose(hg, hg_ref, atol=2e-2, rtol=2e-2), "hG mismatch"
    assert jnp.allclose(log_probs, lp_ref, atol=2e-2, rtol=2e-2), "log_softmax mismatch"

    print("KERNEL_OK")
</pallas_src>

<mosaic_0001>
module attributes {stable_mosaic.version = 11 : i64} {
  func.func @gin_kernel(%arg0: memref<128x128xbf16, #tpu.memory_space<vmem>>, %arg1: memref<128x128xbf16, #tpu.memory_space<vmem>>, %arg2: memref<16x128xbf16, #tpu.memory_space<vmem>>, %arg3: memref<9x128x128xbf16, #tpu.memory_space<vmem>>, %arg4: memref<9x1x128xf32, #tpu.memory_space<vmem>>, %arg5: memref<16x256xf32, #tpu.memory_space<vmem>>) attributes {dimension_semantics = [], scalar_prefetch = 0 : i64, scratch_operands = 0 : i64, tpu.core_type = #tpu.core_type<tc>} {
    %c0 = arith.constant 0 : index
    %c0_0 = arith.constant 0 : index
    %0 = vector.load %arg0[%c0, %c0_0] : memref<128x128xbf16, #tpu.memory_space<vmem>>, vector<128x128xbf16>
    %c0_1 = arith.constant 0 : index
    %c0_2 = arith.constant 0 : index
    %1 = vector.load %arg1[%c0_1, %c0_2] : memref<128x128xbf16, #tpu.memory_space<vmem>>, vector<128x128xbf16>
    %cst = arith.constant dense<0.000000e+00> : vector<128x128xf32>
    %2 = tpu.matmul %1, %0, %cst {dimension_numbers = #tpu.dot_dimension_numbers<[1], [0], [0], [1], [0, 0, 1, 1], [], []>} : vector<128x128xbf16>, vector<128x128xbf16>, vector<128x128xf32> -> vector<128x128xf32>
    %3 = arith.truncf %2 : vector<128x128xf32> to vector<128x128xbf16>
    %c0_3 = arith.constant 0 : index
    %c0_4 = arith.constant 0 : index
    %c0_5 = arith.constant 0 : index
    %4 = vector.load %arg3[%c0_3, %c0_4, %c0_5] : memref<9x128x128xbf16, #tpu.memory_space<vmem>>, vector<1x128x128xbf16>
    %5 = vector.shape_cast %4 : vector<1x128x128xbf16> to vector<128x128xbf16>
    %cst_6 = arith.constant dense<0.000000e+00> : vector<128x128xf32>
    %6 = tpu.matmul %3, %5, %cst_6 {dimension_numbers = #tpu.dot_dimension_numbers<[1], [0], [0], [1], [0, 0, 1, 1], [], []>} : vector<128x128xbf16>, vector<128x128xbf16>, vector<128x128xf32> -> vector<128x128xf32>
    %c0_7 = arith.constant 0 : index
    %c0_8 = arith.constant 0 : index
    %c0_9 = arith.constant 0 : index
    %7 = vector.load %arg4[%c0_7, %c0_8, %c0_9] : memref<9x1x128xf32, #tpu.memory_space<vmem>>, vector<1x1x128xf32>
    %8 = vector.shape_cast %7 : vector<1x1x128xf32> to vector<1x128xf32>
    %9 = vector.broadcast %8 : vector<1x128xf32> to vector<128x128xf32>
    %10 = arith.addf %6, %9 : vector<128x128xf32>
    %cst_10 = arith.constant 0.000000e+00 : f32
    %11 = vector.broadcast %cst_10 : f32 to vector<128x128xf32>
    %12 = arith.maximumf %10, %11 : vector<128x128xf32>
    %13 = arith.truncf %12 : vector<128x128xf32> to vector<128x128xbf16>
    %c1 = arith.constant 1 : index
    %c0_11 = arith.constant 0 : index
    %c0_12 = arith.constant 0 : index
    %14 = vector.load %arg3[%c1, %c0_11, %c0_12] : memref<9x128x128xbf16, #tpu.memory_space<vmem>>, vector<1x128x128xbf16>
    %15 = vector.shape_cast %14 : vector<1x128x128xbf16> to vector<128x128xbf16>
    %cst_13 = arith.constant dense<0.000000e+00> : vector<128x128xf32>
    %16 = tpu.matmul %13, %15, %cst_13 {dimension_numbers = #tpu.dot_dimension_numbers<[1], [0], [0], [1], [0, 0, 1, 1], [], []>} : vector<128x128xbf16>, vector<128x128xbf16>, vector<128x128xf32> -> vector<128x128xf32>
    %c1_14 = arith.constant 1 : index
    %c0_15 = arith.constant 0 : index
    %c0_16 = arith.constant 0 : index
    %17 = vector.load %arg4[%c1_14, %c0_15, %c0_16] : memref<9x1x128xf32, #tpu.memory_space<vmem>>, vector<1x1x128xf32>
    %18 = vector.shape_cast %17 : vector<1x1x128xf32> to vector<1x128xf32>
    %19 = vector.broadcast %18 : vector<1x128xf32> to vector<128x128xf32>
    %20 = arith.addf %16, %19 : vector<128x128xf32>
    %cst_17 = arith.constant 0.000000e+00 : f32
    %21 = vector.broadcast %cst_17 : f32 to vector<128x128xf32>
    %22 = arith.maximumf %20, %21 : vector<128x128xf32>
    %23 = arith.truncf %22 : vector<128x128xf32> to vector<128x128xbf16>
    %c0_18 = arith.constant 0 : index
    %c0_19 = arith.constant 0 : index
    %24 = vector.load %arg1[%c0_18, %c0_19] : memref<128x128xbf16, #tpu.memory_space<vmem>>, vector<128x128xbf16>
    %cst_20 = arith.constant dense<0.000000e+00> : vector<128x128xf32>
    %25 = tpu.matmul %24, %23, %cst_20 {dimension_numbers = #tpu.dot_dimension_numbers<[1], [0], [0], [1], [0, 0, 1, 1], [], []>} : vector<128x128xbf16>, vector<128x128xbf16>, vector<128x128xf32> -> vector<128x128xf32>
    %26 = arith.truncf %25 : vector<128x128xf32> to vector<128x128xbf16>
    %c2 = arith.constant 2 : index
    %c0_21 = arith.constant 0 : index
    %c0_22 = arith.constant 0 : index
    %27 = vector.load %arg3[%c2, %c0_21, %c0_22] : memref<9x128x128xbf16, #tpu.memory_space<vmem>>, vector<1x128x128xbf16>
    %28 = vector.shape_cast %27 : vector<1x128x128xbf16> to vector<128x128xbf16>
    %cst_23 = arith.constant dense<0.000000e+00> : vector<128x128xf32>
    %29 = tpu.matmul %26, %28, %cst_23 {dimension_numbers = #tpu.dot_dimension_numbers<[1], [0], [0], [1], [0, 0, 1, 1], [], []>} : vector<128x128xbf16>, vector<128x128xbf16>, vector<128x128xf32> -> vector<128x128xf32>
    %c2_24 = arith.constant 2 : index
    %c0_25 = arith.constant 0 : index
    %c0_26 = arith.constant 0 : index
    %30 = vector.load %arg4[%c2_24, %c0_25, %c0_26] : memref<9x1x128xf32, #tpu.memory_space<vmem>>, vector<1x1x128xf32>
    %31 = vector.shape_cast %30 : vector<1x1x128xf32> to vector<1x128xf32>
    %32 = vector.broadcast %31 : vector<1x128xf32> to vector<128x128xf32>
    %33 = arith.addf %29, %32 : vector<128x128xf32>
    %cst_27 = arith.constant 0.000000e+00 : f32
    %34 = vector.broadcast %cst_27 : f32 to vector<128x128xf32>
    %35 = arith.maximumf %33, %34 : vector<128x128xf32>
    %36 = arith.truncf %35 : vector<128x128xf32> to vector<128x128xbf16>
    %c3 = arith.constant 3 : index
    %c0_28 = arith.constant 0 : index
    %c0_29 = arith.constant 0 : index
    %37 = vector.load %arg3[%c3, %c0_28, %c0_29] : memref<9x128x128xbf16, #tpu.memory_space<vmem>>, vector<1x128x128xbf16>
    %38 = vector.shape_cast %37 : vector<1x128x128xbf16> to vector<128x128xbf16>
    %cst_30 = arith.constant dense<0.000000e+00> : vector<128x128xf32>
    %39 = tpu.matmul %36, %38, %cst_30 {dimension_numbers = #tpu.dot_dimension_numbers<[1], [0], [0], [1], [0, 0, 1, 1], [], []>} : vector<128x128xbf16>, vector<128x128xbf16>, vector<128x128xf32> -> vector<128x128xf32>
    %c3_31 = arith.constant 3 : index
    %c0_32 = arith.constant 0 : index
    %c0_33 = arith.constant 0 : index
    %40 = vector.load %arg4[%c3_31, %c0_32, %c0_33] : memref<9x1x128xf32, #tpu.memory_space<vmem>>, vector<1x1x128xf32>
    %41 = vector.shape_cast %40 : vector<1x1x128xf32> to vector<1x128xf32>
    %42 = vector.broadcast %41 : vector<1x128xf32> to vector<128x128xf32>
    %43 = arith.addf %39, %42 : vector<128x128xf32>
    %cst_34 = arith.constant 0.000000e+00 : f32
    %44 = vector.broadcast %cst_34 : f32 to vector<128x128xf32>
    %45 = arith.maximumf %43, %44 : vector<128x128xf32>
    %46 = arith.truncf %45 : vector<128x128xf32> to vector<128x128xbf16>
    %c0_35 = arith.constant 0 : index
    %c0_36 = arith.constant 0 : index
    %47 = vector.load %arg1[%c0_35, %c0_36] : memref<128x128xbf16, #tpu.memory_space<vmem>>, vector<128x128xbf16>
    %cst_37 = arith.constant dense<0.000000e+00> : vector<128x128xf32>
    %48 = tpu.matmul %47, %46, %cst_37 {dimension_numbers = #tpu.dot_dimension_numbers<[1], [0], [0], [1], [0, 0, 1, 1], [], []>} : vector<128x128xbf16>, vector<128x128xbf16>, vector<128x128xf32> -> vector<128x128xf32>
    %49 = arith.truncf %48 : vector<128x128xf32> to vector<128x128xbf16>
    %c4 = arith.constant 4 : index
    %c0_38 = arith.constant 0 : index
    %c0_39 = arith.constant 0 : index
    %50 = vector.load %arg3[%c4, %c0_38, %c0_39] : memref<9x128x128xbf16, #tpu.memory_space<vmem>>, vector<1x128x128xbf16>
    %51 = vector.shape_cast %50 : vector<1x128x128xbf16> to vector<128x128xbf16>
    %cst_40 = arith.constant dense<0.000000e+00> : vector<128x128xf32>
    %52 = tpu.matmul %49, %51, %cst_40 {dimension_numbers = #tpu.dot_dimension_numbers<[1], [0], [0], [1], [0, 0, 1, 1], [], []>} : vector<128x128xbf16>, vector<128x128xbf16>, vector<128x128xf32> -> vector<128x128xf32>
    %c4_41 = arith.constant 4 : index
    %c0_42 = arith.constant 0 : index
    %c0_43 = arith.constant 0 : index
    %53 = vector.load %arg4[%c4_41, %c0_42, %c0_43] : memref<9x1x128xf32, #tpu.memory_space<vmem>>, vector<1x1x128xf32>
    %54 = vector.shape_cast %53 : vector<1x1x128xf32> to vector<1x128xf32>
    %55 = vector.broadcast %54 : vector<1x128xf32> to vector<128x128xf32>
    %56 = arith.addf %52, %55 : vector<128x128xf32>
    %cst_44 = arith.constant 0.000000e+00 : f32
    %57 = vector.broadcast %cst_44 : f32 to vector<128x128xf32>
    %58 = arith.maximumf %56, %57 : vector<128x128xf32>
    %59 = arith.truncf %58 : vector<128x128xf32> to vector<128x128xbf16>
    %c5 = arith.constant 5 : index
    %c0_45 = arith.constant 0 : index
    %c0_46 = arith.constant 0 : index
    %60 = vector.load %arg3[%c5, %c0_45, %c0_46] : memref<9x128x128xbf16, #tpu.memory_space<vmem>>, vector<1x128x128xbf16>
    %61 = vector.shape_cast %60 : vector<1x128x128xbf16> to vector<128x128xbf16>
    %cst_47 = arith.constant dense<0.000000e+00> : vector<128x128xf32>
    %62 = tpu.matmul %59, %61, %cst_47 {dimension_numbers = #tpu.dot_dimension_numbers<[1], [0], [0], [1], [0, 0, 1, 1], [], []>} : vector<128x128xbf16>, vector<128x128xbf16>, vector<128x128xf32> -> vector<128x128xf32>
    %c5_48 = arith.constant 5 : index
    %c0_49 = arith.constant 0 : index
    %c0_50 = arith.constant 0 : index
    %63 = vector.load %arg4[%c5_48, %c0_49, %c0_50] : memref<9x1x128xf32, #tpu.memory_space<vmem>>, vector<1x1x128xf32>
    %64 = vector.shape_cast %63 : vector<1x1x128xf32> to vector<1x128xf32>
    %65 = vector.broadcast %64 : vector<1x128xf32> to vector<128x128xf32>
    %66 = arith.addf %62, %65 : vector<128x128xf32>
    %cst_51 = arith.constant 0.000000e+00 : f32
    %67 = vector.broadcast %cst_51 : f32 to vector<128x128xf32>
    %68 = arith.maximumf %66, %67 : vector<128x128xf32>
    %69 = arith.truncf %68 : vector<128x128xf32> to vector<128x128xbf16>
    %c0_52 = arith.constant 0 : index
    %c0_53 = arith.constant 0 : index
    %70 = vector.load %arg1[%c0_52, %c0_53] : memref<128x128xbf16, #tpu.memory_space<vmem>>, vector<128x128xbf16>
    %cst_54 = arith.constant dense<0.000000e+00> : vector<128x128xf32>
    %71 = tpu.matmul %70, %69, %cst_54 {dimension_numbers = #tpu.dot_dimension_numbers<[1], [0], [0], [1], [0, 0, 1, 1], [], []>} : vector<128x128xbf16>, vector<128x128xbf16>, vector<128x128xf32> -> vector<128x128xf32>
    %72 = arith.truncf %71 : vector<128x128xf32> to vector<128x128xbf16>
    %c6 = arith.constant 6 : index
    %c0_55 = arith.constant 0 : index
    %c0_56 = arith.constant 0 : index
    %73 = vector.load %arg3[%c6, %c0_55, %c0_56] : memref<9x128x128xbf16, #tpu.memory_space<vmem>>, vector<1x128x128xbf16>
    %74 = vector.shape_cast %73 : vector<1x128x128xbf16> to vector<128x128xbf16>
    %cst_57 = arith.constant dense<0.000000e+00> : vector<128x128xf32>
    %75 = tpu.matmul %72, %74, %cst_57 {dimension_numbers = #tpu.dot_dimension_numbers<[1], [0], [0], [1], [0, 0, 1, 1], [], []>} : vector<128x128xbf16>, vector<128x128xbf16>, vector<128x128xf32> -> vector<128x128xf32>
    %c6_58 = arith.constant 6 : index
    %c0_59 = arith.constant 0 : index
    %c0_60 = arith.constant 0 : index
    %76 = vector.load %arg4[%c6_58, %c0_59, %c0_60] : memref<9x1x128xf32, #tpu.memory_space<vmem>>, vector<1x1x128xf32>
    %77 = vector.shape_cast %76 : vector<1x1x128xf32> to vector<1x128xf32>
    %78 = vector.broadcast %77 : vector<1x128xf32> to vector<128x128xf32>
    %79 = arith.addf %75, %78 : vector<128x128xf32>
    %cst_61 = arith.constant 0.000000e+00 : f32
    %80 = vector.broadcast %cst_61 : f32 to vector<128x128xf32>
    %81 = arith.maximumf %79, %80 : vector<128x128xf32>
    %82 = arith.truncf %81 : vector<128x128xf32> to vector<128x128xbf16>
    %c7 = arith.constant 7 : index
    %c0_62 = arith.constant 0 : index
    %c0_63 = arith.constant 0 : index
    %83 = vector.load %arg3[%c7, %c0_62, %c0_63] : memref<9x128x128xbf16, #tpu.memory_space<vmem>>, vector<1x128x128xbf16>
    %84 = vector.shape_cast %83 : vector<1x128x128xbf16> to vector<128x128xbf16>
    %cst_64 = arith.constant dense<0.000000e+00> : vector<128x128xf32>
    %85 = tpu.matmul %82, %84, %cst_64 {dimension_numbers = #tpu.dot_dimension_numbers<[1], [0], [0], [1], [0, 0, 1, 1], [], []>} : vector<128x128xbf16>, vector<128x128xbf16>, vector<128x128xf32> -> vector<128x128xf32>
    %c7_65 = arith.constant 7 : index
    %c0_66 = arith.constant 0 : index
    %c0_67 = arith.constant 0 : index
    %86 = vector.load %arg4[%c7_65, %c0_66, %c0_67] : memref<9x1x128xf32, #tpu.memory_space<vmem>>, vector<1x1x128xf32>
    %87 = vector.shape_cast %86 : vector<1x1x128xf32> to vector<1x128xf32>
    %88 = vector.broadcast %87 : vector<1x128xf32> to vector<128x128xf32>
    %89 = arith.addf %85, %88 : vector<128x128xf32>
    %c0_68 = arith.constant 0 : index
    %c0_69 = arith.constant 0 : index
    %90 = vector.load %arg2[%c0_68, %c0_69] : memref<16x128xbf16, #tpu.memory_space<vmem>>, vector<16x128xbf16>
    %91 = arith.truncf %89 : vector<128x128xf32> to vector<128x128xbf16>
    %cst_70 = arith.constant dense<0.000000e+00> : vector<16x128xf32>
    %92 = tpu.matmul %90, %91, %cst_70 {dimension_numbers = #tpu.dot_dimension_numbers<[1], [0], [0], [1], [0, 0, 1, 1], [], []>} : vector<16x128xbf16>, vector<128x128xbf16>, vector<16x128xf32> -> vector<16x128xf32>
    %93 = arith.truncf %92 : vector<16x128xf32> to vector<16x128xbf16>
    %c8 = arith.constant 8 : index
    %c0_71 = arith.constant 0 : index
    %c0_72 = arith.constant 0 : index
    %94 = vector.load %arg3[%c8, %c0_71, %c0_72] : memref<9x128x128xbf16, #tpu.memory_space<vmem>>, vector<1x128x128xbf16>
    %95 = vector.shape_cast %94 : vector<1x128x128xbf16> to vector<128x128xbf16>
    %cst_73 = arith.constant dense<0.000000e+00> : vector<16x128xf32>
    %96 = tpu.matmul %93, %95, %cst_73 {dimension_numbers = #tpu.dot_dimension_numbers<[1], [0], [0], [1], [0, 0, 1, 1], [], []>} : vector<16x128xbf16>, vector<128x128xbf16>, vector<16x128xf32> -> vector<16x128xf32>
    %c8_74 = arith.constant 8 : index
    %c0_75 = arith.constant 0 : index
    %c0_76 = arith.constant 0 : index
    %97 = vector.load %arg4[%c8_74, %c0_75, %c0_76] : memref<9x1x128xf32, #tpu.memory_space<vmem>>, vector<1x1x128xf32>
    %98 = vector.shape_cast %97 : vector<1x1x128xf32> to vector<1x128xf32>
    %99 = vector.broadcast %98 : vector<1x128xf32> to vector<16x128xf32>
    %100 = arith.addf %96, %99 : vector<16x128xf32>
    %101 = tpu.iota {dimensions = array<i32: 1>} : vector<16x128xi32>
    %c8_i32 = arith.constant 8 : i32
    %102 = vector.broadcast %c8_i32 : i32 to vector<16x128xi32>
    %103 = arith.cmpi slt, %101, %102 : vector<16x128xi32>
    %cst_77 = arith.constant -1.000000e+30 : f32
    %104 = vector.broadcast %cst_77 : f32 to vector<16x128xf32>
    %105 = arith.select %103, %100, %104 : vector<16x128xi1>, vector<16x128xf32>
    %cst_78 = arith.constant dense<0xFF800000> : vector<16xf32>
    %106 = vector.multi_reduction <maximumf>, %105, %cst_78 [1] : vector<16x128xf32> to vector<16xf32>
    %107 = vector.shape_cast %106 : vector<16xf32> to vector<16x1xf32>
    %108 = vector.broadcast %107 : vector<16x1xf32> to vector<16x128xf32>
    %109 = arith.subf %105, %108 : vector<16x128xf32>
    %110 = math.exp %109 : vector<16x128xf32>
    %cst_79 = arith.constant dense<0.000000e+00> : vector<16xf32>
    %111 = vector.multi_reduction <add>, %110, %cst_79 [1] : vector<16x128xf32> to vector<16xf32>
    %112 = vector.shape_cast %111 : vector<16xf32> to vector<16x1xf32>
    %113 = math.log %112 : vector<16x1xf32>
    %114 = vector.broadcast %113 : vector<16x1xf32> to vector<16x128xf32>
    %115 = arith.subf %109, %114 : vector<16x128xf32>
    %116 = tpu.concatenate %92, %115 in 1 : vector<16x128xf32>, vector<16x128xf32> -> vector<16x256xf32>
    %c0_80 = arith.constant 0 : index
    %c0_81 = arith.constant 0 : index
    %117 = vector.load %arg5[%c0_80, %c0_81] : memref<16x256xf32, #tpu.memory_space<vmem>>, vector<16x256xf32>
    tpu.vector_store %arg5[%c0_80, %c0_81], %116 {strides = array<i32>} : memref<16x256xf32, #tpu.memory_space<vmem>>, vector<16x256xf32>,
    return
  }
}

</mosaic_0001>

<bundles_post_ra>
// kernel: gin_forward.1
= control target key start
LH: loop header
LB: loop body
LE: loop exit
PB: predicated region body
PF: predicated region fallthrough
CT: control target
= control target key end

     0   :  { %10 = vsyncpa [#allocation3], 0  ;;  %s3187_s18 = smov [#allocation2]   ;;  %s3415_s0 = inlined_call_operand.vmem [shape: bf16[128,128], index: 0, kind: input, shape index: {}]   ;;  %s3416_s1 = inlined_call_operand.vmem [shape: bf16[128,128], index: 1, kind: input, shape index: {}]   ;;  %s3417_s2 = inlined_call_operand.vmem [shape: bf16[16,128], index: 2, kind: input, shape index: {}]   ;;  %s3418_s3 = inlined_call_operand.hbm [shape: bf16[9,128,128], index: 3, kind: input, shape index: {}]   ;;  %s3419_s4 = inlined_call_operand.vmem [shape: f32[9,1,128], index: 4, kind: input, shape index: {}]   ;;  %s3420_s5 = inlined_call_operand.vmem [shape: f32[16,256], index: 5, kind: output, shape index: {}]  }
   0x1   :  { %s22_s19 = sshll.u32 %s3187_s18, 4  ;;  %s23_s19 = int_to_ptr.vmem [resolvable:$true] %s22_s19 }
   0x2   :  { %s3173_s20 = scalar_lea.vmem %s23_s19, 9216  ;;  %p3178_p1 = scmp.lt.s32.totalorder %s23_s19, %s23_s19 }
   0x3   :  { %p3174_p0 = scmp.ne.s32.totalorder %s23_s19, %s3173_s20  ;;  %p3179_p2 = scmp.lt.s32.totalorder %s3173_s20, %s3173_s20 }
   0x5   :  { %p3180_p3 = por %p3179_p2, %p3178_p1 }
   0x7   :  { %p3181_p4 = pnand %p3180_p3, %p3174_p0 }
   0x9   :  { %3184 = shalt.err (!%p3181_p4)
}
   0xa   :  { %s3188_s21 = smov 64   ;;  %s3189_s22 = smov 4  }
   0xb   :  { %28 = dma.hbm_to_vmem [thread:$0]  %s3418_s3, 9216, %s23_s19, [#allocation3], %s3188_s21, %s3188_s21, %s3189_s22  }
   0xc   :  { %3185 = dma.done.wait [#allocation3], 9216  }
   0xd   :  { %3186 = vsyncadd [#allocation3], 4294958080  ;;  %v3060_v0 = vld [vmem:[%s3415_s0 + $0x38] sm:$0xff]   ;;  %v3061_v1 = vld [vmem:[%s3415_s0 + $0x30] sm:$0xff]   ;;  %vm3191_vm0 = vmmov 0  }
   0xe   :  { %2631 = vmatprep.subr.bf16.mxu0 %v3060_v0  ;;  %v3062_v2 = vld [vmem:[%s3415_s0 + $0x28] sm:$0xff]   ;;  %v3063_v3 = vld [vmem:[%s3415_s0 + $0x20] sm:$0xff]   ;;  %v3064_v5 = vld [vmem:[%s3415_s0 + $0x18] sm:$0xff]  }
   0xf   :  { %2632 = vmatpush3.bf16.msra.mxu0 %v3060_v0  ;;  %v3240_v4 = vld [vmem:[%s3416_s1] sm:$0xff]   ;;  %v3065_v6 = vld [vmem:[%s3415_s0 + $0x10] sm:$0xff]   ;;  %v3076_v7 = vld [vmem:[#allocation2 + $0x38] sm:$0xff]  }
  0x10   :  { %2633 = vmatprep.subr.bf16.mxu0 %v3061_v1  ;;  %2647 = vmatprep.mubr.bf16.mxu0 %v3240_v4  ;;  %v3077_v8 = vld [vmem:[#allocation2 + $0x30] sm:$0xff]   ;;  %v3066_v9 = vld [vmem:[%s3415_s0 + $0x8] sm:$0xff]   ;;  %v3067_v11 = vld [vmem:[%s3415_s0] sm:$0xff]  }
  0x11   :  { %2663 = vmatprep.subr.bf16.mxu1 %v3076_v7  ;;  %v3078_v10 = vld [vmem:[#allocation2 + $0x28] sm:$0xff]   ;;  %v3079_v12 = vld [vmem:[#allocation2 + $0x20] sm:$0xff]   ;;  %v3080_v13 = vld [vmem:[#allocation2 + $0x18] sm:$0xff]  }
  0x12   :  { %2664 = vmatpush3.bf16.msra.mxu1 %v3076_v7  ;;  %v3258_v14 = vld [vmem:[%s3416_s1 + $0x8] sm:$0xff]   ;;  %v3263_v15 = vld [vmem:[%s3416_s1 + $0x10] sm:$0xff]   ;;  %v3270_v17 = vld [vmem:[%s3416_s1 + $0x18] sm:$0xff]  }
  0x13   :  { %2634 = vmatpush3.bf16.msra.mxu0 %v3061_v1  ;;  %2665 = vmatprep.subr.bf16.mxu1 %v3077_v8  ;;  %v3081_v16 = vld [vmem:[#allocation2 + $0x10] sm:$0xff]   ;;  %v3275_v18 = vld [vmem:[%s3416_s1 + $0x20] sm:$0xff]   ;;  %v3282_v19 = vld [vmem:[%s3416_s1 + $0x28] sm:$0xff]  }
  0x14   :  { %2635 = vmatprep.subr.bf16.mxu0 %v3062_v2  ;;  %v3287_v20 = vld [vmem:[%s3416_s1 + $0x30] sm:$0xff]   ;;  %v3294_v21 = vld [vmem:[%s3416_s1 + $0x38] sm:$0xff]   ;;  %v3082_v22 = vld [vmem:[#allocation2 + $0x8] sm:$0xff]  }
  0x15   :  { %v3083_v23 = vld [vmem:[#allocation2] sm:$0xff]   ;;  %v3084_v24 = vld [vmem:[#allocation2 + $0x78] sm:$0xff]   ;;  %v3085_v25 = vld [vmem:[#allocation2 + $0x70] sm:$0xff]  }
  0x16   :  { %2666 = vmatpush3.bf16.msra.mxu1 %v3077_v8  ;;  %v3086_v26 = vld [vmem:[#allocation2 + $0x68] sm:$0xff]   ;;  %v3087_v27 = vld [vmem:[#allocation2 + $0x60] sm:$0xff]   ;;  %v3088_v28 = vld [vmem:[#allocation2 + $0x58] sm:$0xff]  }
  0x17   :  { %2636 = vmatpush3.bf16.msra.mxu0 %v3062_v2  ;;  %2667 = vmatprep.subr.bf16.mxu1 %v3078_v10  ;;  %v3089_v53 = vld [vmem:[#allocation2 + $0x50] sm:$0xff]   ;;  %v3090_v54 = vld [vmem:[#allocation2 + $0x48] sm:$0xff]   ;;  %v3091_v55 = vld [vmem:[#allocation2 + $0x40] sm:$0xff]  }
  0x18   :  { %2637 = vmatprep.subr.bf16.mxu0 %v3063_v3  ;;  %v2331_v58 = vld [vmem:[%s3419_s4] ss:$0 sm:$0xff] }
  0x1a   :  { %2668 = vmatpush3.bf16.msra.mxu1 %v3078_v10 }
  0x1b   :  { %2638 = vmatpush3.bf16.msra.mxu0 %v3063_v3  ;;  %2669 = vmatprep.subr.bf16.mxu1 %v3079_v12 }
  0x1c   :  { %2639 = vmatprep.subr.bf16.mxu0 %v3064_v5 }
  0x1e   :  { %2670 = vmatpush3.bf16.msra.mxu1 %v3079_v12 }
  0x1f   :  { %2640 = vmatpush3.bf16.msra.mxu0 %v3064_v5  ;;  %2671 = vmatprep.subr.bf16.mxu1 %v3080_v13 }
  0x20   :  { %2641 = vmatprep.subr.bf16.mxu0 %v3065_v6 }
  0x22   :  { %2672 = vmatpush3.bf16.msra.mxu1 %v3080_v13 }
  0x23   :  { %2642 = vmatpush3.bf16.msra.mxu0 %v3065_v6  ;;  %2673 = vmatprep.subr.bf16.mxu1 %v3081_v16 }
  0x24   :  { %2643 = vmatprep.subr.bf16.mxu0 %v3066_v9 }
  0x26   :  { %2674 = vmatpush3.bf16.msra.mxu1 %v3081_v16 }
  0x27   :  { %2644 = vmatpush3.bf16.msra.mxu0 %v3066_v9  ;;  %2675 = vmatprep.subr.bf16.mxu1 %v3082_v22 }
  0x28   :  { %2645 = vmatprep.subr.bf16.mxu0 %v3067_v11 }
  0x2a   :  { %2676 = vmatpush3.bf16.msra.mxu1 %v3082_v22 }
  0x2b   :  { %2646 = vmatpush3.bf16.msra.mxu0 %v3067_v11  ;;  %2677 = vmatprep.subr.bf16.mxu1 %v3083_v23 }
  0x2c   :  { %2695 = vmatprep.subr.bf16.mxu0 %v3084_v24 }
  0x2e   :  { %2648 = vmatmul.mubr.bf16.vlgmr.msra.gmra.mxu0 %v3258_v14  ;;  %2678 = vmatpush3.bf16.msra.mxu1 %v3083_v23 }
  0x2f   :  { %2651 = vmatprep.mubr.bf16.mxu0 %v3263_v15  ;;  %2696 = vmatpush3.bf16.msra.mxu0 %v3084_v24 }
  0x30   :  { %2697 = vmatprep.subr.bf16.mxu0 %v3085_v25 }
  0x33   :  { %2698 = vmatpush3.bf16.msra.mxu0 %v3085_v25 }
  0x34   :  { %2699 = vmatprep.subr.bf16.mxu0 %v3086_v26 }
  0x36   :  { %2652 = vmatmul.mubr.bf16.gmra.mxu0 %v3270_v17 }
  0x37   :  { %2655 = vmatprep.mubr.bf16.mxu0 %v3275_v18  ;;  %2700 = vmatpush3.bf16.msra.mxu0 %v3086_v26 }
  0x38   :  { %2701 = vmatprep.subr.bf16.mxu0 %v3087_v27 }
  0x3b   :  { %2702 = vmatpush3.bf16.msra.mxu0 %v3087_v27 }
  0x3c   :  { %2703 = vmatprep.subr.bf16.mxu0 %v3088_v28 }
  0x3e   :  { %2656 = vmatmul.mubr.bf16.gmra.mxu0 %v3282_v19 }
  0x3f   :  { %2659 = vmatprep.mubr.bf16.mxu0 %v3287_v20  ;;  %2704 = vmatpush3.bf16.msra.mxu0 %v3088_v28 }
  0x40   :  { %2705 = vmatprep.subr.bf16.mxu0 %v3089_v53 }
  0x43   :  { %2706 = vmatpush3.bf16.msra.mxu0 %v3089_v53 }
  0x44   :  { %2707 = vmatprep.subr.bf16.mxu0 %v3090_v54 }
  0x46   :  { %2660 = vmatmul.mubr.bf16.gmra.mxu0 %v3294_v21 }
  0x47   :  { %2708 = vmatpush3.bf16.msra.mxu0 %v3090_v54 }
  0x48   :  { %2709 = vmatprep.subr.bf16.mxu0 %v3091_v55 }
  0x4b   :  { %2710 = vmatpush3.bf16.msra.mxu0 %v3091_v55 }
  0xee   :  { %v2649_v29 = vpop.f32.mrf.mxu0 }
  0xf0   :  { %v197_v30 = vpop.f32.mrf.mxu0 }
  0xf2   :  { %v2650_v31 = vpop.f32.mrf.mxu0 }
  0xf3   :  { %v261_v34 = vpack.c.bf16 %v2650_v31, %v2649_v29 }
  0xf4   :  { %v200_v32 = vpop.f32.mrf.mxu0 }
  0xf5   :  { %v260_v33 = vpack.c.bf16 %v200_v32, %v197_v30 }
  0xf6   :  { %v2653_v35 = vpop.f32.mrf.mxu0 }
  0xf7   :  { %2679 = vmatprep.mubr.bf16.mxu1 %v260_v33 }
  0xf8   :  { %v213_v36 = vpop.f32.mrf.mxu0  ;;  %2680 = vmatmul.mubr.bf16.vlgmr.msra.gmra.mxu1 %v261_v34 }
  0xfa   :  { %v2654_v37 = vpop.f32.mrf.mxu0 }
  0xfb   :  { %v263_v40 = vpack.c.bf16 %v2654_v37, %v2653_v35 }
  0xfc   :  { %v216_v38 = vpop.f32.mrf.mxu0 }
  0xfd   :  { %v262_v39 = vpack.c.bf16 %v216_v38, %v213_v36 }
  0xfe   :  { %v2657_v41 = vpop.f32.mrf.mxu0 }
  0xff   :  { %2683 = vmatprep.mubr.bf16.mxu1 %v262_v39 }
 0x100   :  { %v229_v42 = vpop.f32.mrf.mxu0  ;;  %2684 = vmatmul.mubr.bf16.gmra.mxu1 %v263_v40 }
 0x102   :  { %v2658_v43 = vpop.f32.mrf.mxu0 }
 0x103   :  { %v265_v46 = vpack.c.bf16 %v2658_v43, %v2657_v41 }
 0x104   :  { %v232_v44 = vpop.f32.mrf.mxu0 }
 0x105   :  { %v264_v45 = vpack.c.bf16 %v232_v44, %v229_v42 }
 0x106   :  { %v2661_v47 = vpop.f32.mrf.mxu0 }
 0x107   :  { %2687 = vmatprep.mubr.bf16.mxu1 %v264_v45 }
 0x108   :  { %v245_v48 = vpop.f32.mrf.mxu0  ;;  %2688 = vmatmul.mubr.bf16.gmra.mxu1 %v265_v46 }
 0x10a   :  { %v2662_v49 = vpop.f32.mrf.mxu0 }
 0x10b   :  { %v267_v52 = vpack.c.bf16 %v2662_v49, %v2661_v47 }
 0x10c   :  { %v248_v50 = vpop.f32.mrf.mxu0 }
 0x10d   :  { %v266_v51 = vpack.c.bf16 %v248_v50, %v245_v48 }
 0x10f   :  { %2691 = vmatprep.mubr.bf16.mxu1 %v266_v51 }
 0x110   :  { %2692 = vmatmul.mubr.bf16.gmra.mxu1 %v267_v52 }
 0x111   :  { %2743 = vmatprep.mubr.bf16.mxu1 %v3240_v4 }
 0x1b8   :  { %v2681_v56 = vpop.f32.mrf.mxu1 }
 0x1b9   :  { %v382_v62 = vadd.f32 %v2681_v56, %v2331_v58 }
 0x1ba   :  { %v373_v57 = vpop.f32.mrf.mxu1 }
 0x1bb   :  { %v374_v60 = vadd.f32 %v2331_v58, %v373_v57  ;;  %v438_v6 = vmax.f32 %v382_v62, 0.0  ;;  %v3092_v57 = vld [vmem:[#allocation2 + $0xb8] sm:$0xff]   ;;  %v3097_v62 = vld [vmem:[#allocation2 + $0x90] sm:$0xff]  }
 0x1bc   :  { %v2682_v59 = vpop.f32.mrf.mxu1  ;;  %2759 = vmatprep.subr.bf16.mxu0 %v3092_v57 }
 0x1bd   :  { %v385_v61 = vadd.f32 %v2682_v59, %v2331_v58  ;;  %v436_v3 = vmax.f32 %v374_v60, 0.0  ;;  %v3093_v59 = vld [vmem:[#allocation2 + $0xb0] sm:$0xff]   ;;  %v3094_v60 = vld [vmem:[#allocation2 + $0xa8] sm:$0xff]  }
 0x1be   :  { %v376_v63 = vpop.f32.mrf.mxu1 }
 0x1bf   :  { %v377_v0 = vadd.f32 %v2331_v58, %v376_v63  ;;  %v439_v1 = vmax.f32 %v385_v61, 0.0  ;;  %v3095_v61 = vld [vmem:[#allocation2 + $0xa0] sm:$0xff]  }
 0x1c0   :  { %v2685_v2 = vpop.f32.mrf.mxu1 }
 0x1c1   :  { %v437_v5 = vmax.f32 %v377_v0, 0.0  ;;  %v453_v9 = vpack.c.bf16 %v439_v1, %v438_v6  ;;  %v398_v13 = vadd.f32 %v2685_v2, %v2331_v58 }
 0x1c2   :  { %v389_v7 = vpop.f32.mrf.mxu1 }
 0x1c3   :  { %v452_v8 = vpack.c.bf16 %v437_v5, %v436_v3  ;;  %v390_v11 = vadd.f32 %v2331_v58, %v389_v7  ;;  %v442_v27 = vmax.f32 %v398_v13, 0.0  ;;  %v2341_v13 = vld [vmem:[%s3419_s4 + $0x1] ss:$0 sm:$0xff] }
 0x1c4   :  { %v2686_v10 = vpop.f32.mrf.mxu1 }
 0x1c5   :  { %v401_v12 = vadd.f32 %v2686_v10, %v2331_v58  ;;  %2711 = vmatprep.mubr.bf16.mxu0 %v452_v8  ;;  %v440_v25 = vmax.f32 %v390_v11, 0.0 }
 0x1c6   :  { %v392_v16 = vpop.f32.mrf.mxu1  ;;  %2712 = vmatmul.mubr.bf16.vlgmr.msra.gmra.mxu0 %v453_v9 }
 0x1c7   :  { %v393_v22 = vadd.f32 %v2331_v58, %v392_v16  ;;  %v443_v23 = vmax.f32 %v401_v12, 0.0  ;;  %2760 = vmatpush3.bf16.msra.mxu0 %v3092_v57 }
 0x1c8   :  { %v2689_v24 = vpop.f32.mrf.mxu1  ;;  %2761 = vmatprep.subr.bf16.mxu0 %v3093_v59 }
 0x1c9   :  { %v441_v26 = vmax.f32 %v393_v22, 0.0  ;;  %v455_v30 = vpack.c.bf16 %v443_v23, %v442_v27  ;;  %v414_v34 = vadd.f32 %v2689_v24, %v2331_v58 }
 0x1ca   :  { %v405_v28 = vpop.f32.mrf.mxu1 }
 0x1cb   :  { %v454_v29 = vpack.c.bf16 %v441_v26, %v440_v25  ;;  %v406_v32 = vadd.f32 %v2331_v58, %v405_v28  ;;  %v446_v41 = vmax.f32 %v414_v34, 0.0  ;;  %2762 = vmatpush3.bf16.msra.mxu0 %v3093_v59 }
 0x1cc   :  { %v2690_v31 = vpop.f32.mrf.mxu1  ;;  %2763 = vmatprep.subr.bf16.mxu0 %v3094_v60 }
 0x1cd   :  { %v417_v33 = vadd.f32 %v2690_v31, %v2331_v58  ;;  %2715 = vmatprep.mubr.bf16.mxu0 %v454_v29  ;;  %v444_v39 = vmax.f32 %v406_v32, 0.0 }
 0x1ce   :  { %v408_v35 = vpop.f32.mrf.mxu1  ;;  %2716 = vmatmul.mubr.bf16.gmra.mxu0 %v455_v30 }
 0x1cf   :  { %v409_v36 = vadd.f32 %v2331_v58, %v408_v35  ;;  %v447_v37 = vmax.f32 %v417_v33, 0.0  ;;  %2764 = vmatpush3.bf16.msra.mxu0 %v3094_v60 }
 0x1d0   :  { %v2693_v38 = vpop.f32.mrf.mxu1  ;;  %2765 = vmatprep.subr.bf16.mxu0 %v3095_v61 }
 0x1d1   :  { %v445_v40 = vmax.f32 %v409_v36, 0.0  ;;  %v457_v44 = vpack.c.bf16 %v447_v37, %v446_v41  ;;  %v430_v48 = vadd.f32 %v2693_v38, %v2331_v58 }
 0x1d2   :  { %v421_v42 = vpop.f32.mrf.mxu1 }
 0x1d3   :  { %v456_v43 = vpack.c.bf16 %v445_v40, %v444_v39  ;;  %v422_v46 = vadd.f32 %v2331_v58, %v421_v42  ;;  %v450_v54 = vmax.f32 %v430_v48, 0.0  ;;  %2766 = vmatpush3.bf16.msra.mxu0 %v3095_v61 }
 0x1d4   :  { %v2694_v45 = vpop.f32.mrf.mxu1 }
 0x1d5   :  { %v433_v47 = vadd.f32 %v2694_v45, %v2331_v58  ;;  %2719 = vmatprep.mubr.bf16.mxu0 %v456_v43  ;;  %v448_v52 = vmax.f32 %v422_v46, 0.0 }
 0x1d6   :  { %v424_v49 = vpop.f32.mrf.mxu1  ;;  %2720 = vmatmul.mubr.bf16.gmra.mxu0 %v457_v44 }
 0x1d7   :  { %v425_v50 = vadd.f32 %v2331_v58, %v424_v49  ;;  %v451_v51 = vmax.f32 %v433_v47, 0.0  ;;  %v3096_v58 = vld [vmem:[#allocation2 + $0x98] sm:$0xff]  }
 0x1d8   :  { %2767 = vmatprep.subr.bf16.mxu0 %v3096_v58 }
 0x1d9   :  { %v449_v53 = vmax.f32 %v425_v50, 0.0  ;;  %v459_v56 = vpack.c.bf16 %v451_v51, %v450_v54  ;;  %2768 = vmatpush3.bf16.msra.mxu0 %v3096_v58 }
 0x1da   :  { %2769 = vmatprep.subr.bf16.mxu0 %v3097_v62 }
 0x1db   :  { %v458_v55 = vpack.c.bf16 %v449_v53, %v448_v52 }
 0x1dd   :  { %2723 = vmatprep.mubr.bf16.mxu0 %v458_v55  ;;  %2770 = vmatpush3.bf16.msra.mxu0 %v3097_v62 }
 0x1de   :  { %2724 = vmatmul.mubr.bf16.gmra.mxu0 %v459_v56 }
 0x286   :  { %v2713_v63 = vpop.f32.mrf.mxu0 }
 0x287   :  { %v576_v53 = vadd.f32 %v2713_v63, %v2341_v13  ;;  %v3098_v63 = vld [vmem:[#allocation2 + $0x88] sm:$0xff]  }
 0x288   :  { %v567_v0 = vpop.f32.mrf.mxu0  ;;  %2771 = vmatprep.subr.bf16.mxu0 %v3098_v63 }
 0x289   :  { %v632_v59 = vmax.f32 %v576_v53, 0.0  ;;  %v568_v60 = vadd.f32 %v2341_v13, %v567_v0  ;;  %2772 = vmatpush3.bf16.msra.mxu0 %v3098_v63  ;;  %v3099_v0 = vld [vmem:[#allocation2 + $0x80] sm:$0xff]  }
 0x28a   :  { %v2714_v1 = vpop.f32.mrf.mxu0  ;;  %2773 = vmatprep.subr.bf16.mxu0 %v3099_v0 }
 0x28b   :  { %v579_v50 = vadd.f32 %v2714_v1, %v2341_v13  ;;  %v630_v62 = vmax.f32 %v568_v60, 0.0  ;;  %v3100_v1 = vld [vmem:[#allocation2 + $0xf8] sm:$0xff]  }
 0x28c   :  { %v570_v2 = vpop.f32.mrf.mxu0 }
 0x28d   :  { %v633_v55 = vmax.f32 %v579_v50, 0.0  ;;  %v571_v56 = vadd.f32 %v2341_v13, %v570_v2  ;;  %2774 = vmatpush3.bf16.msra.mxu0 %v3099_v0 }
 0x28e   :  { %v2717_v3 = vpop.f32.mrf.mxu0 }
 0x28f   :  { %v592_v43 = vadd.f32 %v2717_v3, %v2341_v13  ;;  %v647_v61 = vpack.c.bf16 %v633_v55, %v632_v59  ;;  %v631_v58 = vmax.f32 %v571_v56, 0.0 }
 0x290   :  { %v583_v5 = vpop.f32.mrf.mxu0 }
 0x291   :  { %v636_v48 = vmax.f32 %v592_v43, 0.0  ;;  %v584_v49 = vadd.f32 %v2341_v13, %v583_v5  ;;  %v646_v3 = vpack.c.bf16 %v631_v58, %v630_v62 }
 0x292   :  { %v2718_v6 = vpop.f32.mrf.mxu0 }
 0x293   :  { %v595_v40 = vadd.f32 %v2718_v6, %v2341_v13  ;;  %v634_v54 = vmax.f32 %v584_v49, 0.0 }
 0x294   :  { %v586_v7 = vpop.f32.mrf.mxu0 }
 0x295   :  { %v637_v45 = vmax.f32 %v595_v40, 0.0  ;;  %v587_v46 = vadd.f32 %v2341_v13, %v586_v7 }
 0x296   :  { %v2721_v8 = vpop.f32.mrf.mxu0 }
 0x297   :  { %v608_v31 = vadd.f32 %v2721_v8, %v2341_v13  ;;  %v649_v51 = vpack.c.bf16 %v637_v45, %v636_v48  ;;  %v635_v52 = vmax.f32 %v587_v46, 0.0 }
 0x298   :  { %v599_v9 = vpop.f32.mrf.mxu0 }
 0x299   :  { %v640_v38 = vmax.f32 %v608_v31, 0.0  ;;  %v600_v39 = vadd.f32 %v2341_v13, %v599_v9  ;;  %v648_v57 = vpack.c.bf16 %v635_v52, %v634_v54 }
 0x29a   :  { %v2722_v10 = vpop.f32.mrf.mxu0 }
 0x29b   :  { %v611_v27 = vadd.f32 %v2722_v10, %v2341_v13  ;;  %v638_v44 = vmax.f32 %v600_v39, 0.0 }
 0x29c   :  { %v602_v11 = vpop.f32.mrf.mxu0 }
 0x29d   :  { %v641_v35 = vmax.f32 %v611_v27, 0.0  ;;  %v603_v36 = vadd.f32 %v2341_v13, %v602_v11 }
 0x29e   :  { %v2725_v12 = vpop.f32.mrf.mxu0 }
 0x29f   :  { %v624_v22 = vadd.f32 %v2725_v12, %v2341_v13  ;;  %v651_v41 = vpack.c.bf16 %v641_v35, %v640_v38  ;;  %v639_v42 = vmax.f32 %v603_v36, 0.0  ;;  %v3107_v35 = vld [vmem:[#allocation2 + $0xc0] sm:$0xff]  }
 0x2a0   :  { %v615_v16 = vpop.f32.mrf.mxu0  ;;  %v2351_v38 = vld [vmem:[%s3419_s4 + $0x2] ss:$0 sm:$0xff] }
 0x2a1   :  { %v616_v24 = vadd.f32 %v2341_v13, %v615_v16  ;;  %v644_v28 = vmax.f32 %v624_v22, 0.0  ;;  %v650_v47 = vpack.c.bf16 %v639_v42, %v638_v44 }
 0x2a2   :  { %v2726_v23 = vpop.f32.mrf.mxu0 }
 0x2a3   :  { %v627_v25 = vadd.f32 %v2726_v23, %v2341_v13  ;;  %v642_v32 = vmax.f32 %v616_v24, 0.0 }
 0x2a4   :  { %v618_v26 = vpop.f32.mrf.mxu0 }
 0x2a5   :  { %v645_v29 = vmax.f32 %v627_v25, 0.0  ;;  %v619_v30 = vadd.f32 %v2341_v13, %v618_v26 }
 0x2a7   :  { %v653_v33 = vpack.c.bf16 %v645_v29, %v644_v28  ;;  %v643_v34 = vmax.f32 %v619_v30, 0.0 }
 0x2a9   :  { %v652_v37 = vpack.c.bf16 %v643_v34, %v642_v32  ;;  %2727 = vmatprep.subr.bf16.mxu1 %v653_v33  ;;  %v3106_v34 = vld [vmem:[#allocation2 + $0xc8] sm:$0xff]  }
 0x2aa   :  { %2728 = vmatpush3.bf16.msra.mxu1 %v653_v33  ;;  %v3105_v33 = vld [vmem:[#allocation2 + $0xd0] sm:$0xff]  }
 0x2ab   :  { %2729 = vmatprep.subr.bf16.mxu1 %v652_v37 }
 0x2ae   :  { %2730 = vmatpush3.bf16.msra.mxu1 %v652_v37 }
 0x2af   :  { %2731 = vmatprep.subr.bf16.mxu1 %v651_v41 }
 0x2b2   :  { %2732 = vmatpush3.bf16.msra.mxu1 %v651_v41 }
 0x2b3   :  { %2733 = vmatprep.subr.bf16.mxu1 %v650_v47 }
 0x2b6   :  { %2734 = vmatpush3.bf16.msra.mxu1 %v650_v47 }
 0x2b7   :  { %2735 = vmatprep.subr.bf16.mxu1 %v649_v51 }
 0x2ba   :  { %2736 = vmatpush3.bf16.msra.mxu1 %v649_v51 }
 0x2bb   :  { %2737 = vmatprep.subr.bf16.mxu1 %v648_v57 }
 0x2be   :  { %2738 = vmatpush3.bf16.msra.mxu1 %v648_v57 }
 0x2bf   :  { %2739 = vmatprep.subr.bf16.mxu1 %v647_v61 }
 0x2c2   :  { %2740 = vmatpush3.bf16.msra.mxu1 %v647_v61 }
 0x2c3   :  { %2741 = vmatprep.subr.bf16.mxu1 %v646_v3 }
 0x2c6   :  { %2742 = vmatpush3.bf16.msra.mxu1 %v646_v3 }
 0x2c7   :  { %2791 = vmatprep.subr.bf16.mxu1 %v3100_v1 }
 0x2c9   :  { %2744 = vmatmul.mubr.bf16.vlgmr.msra.gmra.mxu1 %v3258_v14  ;;  %v3101_v14 = vld [vmem:[#allocation2 + $0xf0] sm:$0xff]  }
 0x2ca   :  { %2747 = vmatprep.mubr.bf16.mxu1 %v3263_v15  ;;  %2792 = vmatpush3.bf16.msra.mxu1 %v3100_v1  ;;  %v3102_v15 = vld [vmem:[#allocation2 + $0xe8] sm:$0xff]  }
 0x2cb   :  { %2793 = vmatprep.subr.bf16.mxu1 %v3101_v14 }
 0x2ce   :  { %2794 = vmatpush3.bf16.msra.mxu1 %v3101_v14 }
 0x2cf   :  { %2795 = vmatprep.subr.bf16.mxu1 %v3102_v15 }
 0x2d1   :  { %2748 = vmatmul.mubr.bf16.gmra.mxu1 %v3270_v17  ;;  %v3103_v17 = vld [vmem:[#allocation2 + $0xe0] sm:$0xff]  }
 0x2d2   :  { %2751 = vmatprep.mubr.bf16.mxu1 %v3275_v18  ;;  %2796 = vmatpush3.bf16.msra.mxu1 %v3102_v15  ;;  %v3104_v18 = vld [vmem:[#allocation2 + $0xd8] sm:$0xff]  }
 0x2d3   :  { %2797 = vmatprep.subr.bf16.mxu1 %v3103_v17 }
 0x2d6   :  { %2798 = vmatpush3.bf16.msra.mxu1 %v3103_v17 }
 0x2d7   :  { %2799 = vmatprep.subr.bf16.mxu1 %v3104_v18 }
 0x2d9   :  { %2752 = vmatmul.mubr.bf16.gmra.mxu1 %v3282_v19 }
 0x2da   :  { %2755 = vmatprep.mubr.bf16.mxu1 %v3287_v20  ;;  %2800 = vmatpush3.bf16.msra.mxu1 %v3104_v18 }
 0x2db   :  { %2801 = vmatprep.subr.bf16.mxu1 %v3105_v33 }
 0x2de   :  { %2802 = vmatpush3.bf16.msra.mxu1 %v3105_v33  ;;  %v3111_v33 = vld [vmem:[#allocation2 + $0x120] sm:$0xff]  }
 0x2df   :  { %2803 = vmatprep.subr.bf16.mxu1 %v3106_v34 }
 0x2e1   :  { %2756 = vmatmul.mubr.bf16.gmra.mxu1 %v3294_v21 }
 0x2e2   :  { %2804 = vmatpush3.bf16.msra.mxu1 %v3106_v34  ;;  %v3112_v34 = vld [vmem:[#allocation2 + $0x118] sm:$0xff]  }
 0x2e3   :  { %2805 = vmatprep.subr.bf16.mxu1 %v3107_v35 }
 0x2e6   :  { %2806 = vmatpush3.bf16.msra.mxu1 %v3107_v35  ;;  %v3113_v35 = vld [vmem:[#allocation2 + $0x110] sm:$0xff]  }
 0x389   :  { %v2745_v19 = vpop.f32.mrf.mxu1 }
 0x38b   :  { %v688_v20 = vpop.f32.mrf.mxu1 }
 0x38d   :  { %v2746_v2 = vpop.f32.mrf.mxu1 }
 0x38e   :  { %v752_v7 = vpack.c.bf16 %v2746_v2, %v2745_v19 }
 0x38f   :  { %v691_v5 = vpop.f32.mrf.mxu1 }
 0x390   :  { %v751_v6 = vpack.c.bf16 %v691_v5, %v688_v20 }
 0x391   :  { %v2749_v8 = vpop.f32.mrf.mxu1 }
 0x392   :  { %2775 = vmatprep.mubr.bf16.mxu0 %v751_v6 }
 0x393   :  { %v704_v9 = vpop.f32.mrf.mxu1  ;;  %2776 = vmatmul.mubr.bf16.vlgmr.msra.gmra.mxu0 %v752_v7 }
 0x395   :  { %v2750_v10 = vpop.f32.mrf.mxu1 }
 0x396   :  { %v754_v13 = vpack.c.bf16 %v2750_v10, %v2749_v8 }
 0x397   :  { %v707_v11 = vpop.f32.mrf.mxu1 }
 0x398   :  { %v753_v12 = vpack.c.bf16 %v707_v11, %v704_v9 }
 0x399   :  { %v2753_v16 = vpop.f32.mrf.mxu1 }
 0x39a   :  { %2779 = vmatprep.mubr.bf16.mxu0 %v753_v12 }
 0x39b   :  { %v720_v22 = vpop.f32.mrf.mxu1  ;;  %2780 = vmatmul.mubr.bf16.gmra.mxu0 %v754_v13 }
 0x39d   :  { %v2754_v23 = vpop.f32.mrf.mxu1 }
 0x39e   :  { %v756_v26 = vpack.c.bf16 %v2754_v23, %v2753_v16 }
 0x39f   :  { %v723_v24 = vpop.f32.mrf.mxu1 }
 0x3a0   :  { %v755_v25 = vpack.c.bf16 %v723_v24, %v720_v22 }
 0x3a1   :  { %v2757_v27 = vpop.f32.mrf.mxu1 }
 0x3a2   :  { %2783 = vmatprep.mubr.bf16.mxu0 %v755_v25 }
 0x3a3   :  { %v736_v28 = vpop.f32.mrf.mxu1  ;;  %2784 = vmatmul.mubr.bf16.gmra.mxu0 %v756_v26 }
 0x3a5   :  { %v2758_v29 = vpop.f32.mrf.mxu1 }
 0x3a6   :  { %v758_v32 = vpack.c.bf16 %v2758_v29, %v2757_v27 }
 0x3a7   :  { %v739_v30 = vpop.f32.mrf.mxu1 }
 0x3a8   :  { %v757_v31 = vpack.c.bf16 %v739_v30, %v736_v28  ;;  %v3108_v30 = vld [vmem:[#allocation2 + $0x138] sm:$0xff]  }
 0x3a9   :  { %2855 = vmatprep.subr.bf16.mxu1 %v3108_v30 }
 0x3aa   :  { %2787 = vmatprep.mubr.bf16.mxu0 %v757_v31  ;;  %v3109_v31 = vld [vmem:[#allocation2 + $0x130] sm:$0xff]  }
 0x3ab   :  { %2788 = vmatmul.mubr.bf16.gmra.mxu0 %v758_v32  ;;  %v3110_v32 = vld [vmem:[#allocation2 + $0x128] sm:$0xff]  }
 0x3ac   :  { %2839 = vmatprep.mubr.bf16.mxu0 %v3240_v4 }
 0x453   :  { %v2777_v36 = vpop.f32.mrf.mxu0 }
 0x454   :  { %v875_v42 = vadd.f32 %v2777_v36, %v2351_v38 }
 0x455   :  { %v866_v37 = vpop.f32.mrf.mxu0 }
 0x456   :  { %v867_v40 = vadd.f32 %v2351_v38, %v866_v37  ;;  %v931_v48 = vmax.f32 %v875_v42, 0.0 }
 0x457   :  { %v2778_v39 = vpop.f32.mrf.mxu0 }
 0x458   :  { %v878_v41 = vadd.f32 %v2778_v39, %v2351_v38  ;;  %v929_v46 = vmax.f32 %v867_v40, 0.0 }
 0x459   :  { %v869_v4 = vpop.f32.mrf.mxu0 }
 0x45a   :  { %v870_v43 = vadd.f32 %v2351_v38, %v869_v4  ;;  %v932_v44 = vmax.f32 %v878_v41, 0.0 }
 0x45b   :  { %v2781_v45 = vpop.f32.mrf.mxu0 }
 0x45c   :  { %v930_v47 = vmax.f32 %v870_v43, 0.0  ;;  %v946_v51 = vpack.c.bf16 %v932_v44, %v931_v48  ;;  %v891_v55 = vadd.f32 %v2781_v45, %v2351_v38  ;;  %v2361_v48 = vld [vmem:[%s3419_s4 + $0x3] ss:$0 sm:$0xff] }
 0x45d   :  { %v882_v49 = vpop.f32.mrf.mxu0 }
 0x45e   :  { %v945_v50 = vpack.c.bf16 %v930_v47, %v929_v46  ;;  %v883_v53 = vadd.f32 %v2351_v38, %v882_v49  ;;  %v935_v62 = vmax.f32 %v891_v55, 0.0 }
 0x45f   :  { %v2782_v52 = vpop.f32.mrf.mxu0 }
 0x460   :  { %v894_v54 = vadd.f32 %v2782_v52, %v2351_v38  ;;  %2807 = vmatprep.mubr.bf16.mxu1 %v945_v50  ;;  %v933_v61 = vmax.f32 %v883_v53, 0.0 }
 0x461   :  { %v885_v56 = vpop.f32.mrf.mxu0  ;;  %2808 = vmatmul.mubr.bf16.vlgmr.msra.gmra.mxu1 %v946_v51 }
 0x462   :  { %v886_v57 = vadd.f32 %v2351_v38, %v885_v56  ;;  %v936_v59 = vmax.f32 %v894_v54, 0.0  ;;  %2856 = vmatpush3.bf16.msra.mxu1 %v3108_v30  ;;  %v3321_v30 = vld [vmem:[%s3416_s1 + $0x8] sm:$0xff]  }
 0x463   :  { %v2785_v60 = vpop.f32.mrf.mxu0  ;;  %2857 = vmatprep.subr.bf16.mxu1 %v3109_v31 }
 0x464   :  { %v934_v58 = vmax.f32 %v886_v57, 0.0  ;;  %v948_v0 = vpack.c.bf16 %v936_v59, %v935_v62  ;;  %v907_v17 = vadd.f32 %v2785_v60, %v2351_v38 }
 0x465   :  { %v898_v3 = vpop.f32.mrf.mxu0 }
 0x466   :  { %v947_v63 = vpack.c.bf16 %v934_v58, %v933_v61  ;;  %v899_v14 = vadd.f32 %v2351_v38, %v898_v3  ;;  %v939_v7 = vmax.f32 %v907_v17, 0.0  ;;  %2858 = vmatpush3.bf16.msra.mxu1 %v3109_v31  ;;  %v3327_v31 = vld [vmem:[%s3416_s1 + $0x10] sm:$0xff]  }
 0x467   :  { %v2786_v1 = vpop.f32.mrf.mxu0  ;;  %2859 = vmatprep.subr.bf16.mxu1 %v3110_v32 }
 0x468   :  { %v910_v15 = vadd.f32 %v2786_v1, %v2351_v38  ;;  %2811 = vmatprep.mubr.bf16.mxu1 %v947_v63  ;;  %v937_v5 = vmax.f32 %v899_v14, 0.0 }
 0x469   :  { %v901_v18 = vpop.f32.mrf.mxu0  ;;  %2812 = vmatmul.mubr.bf16.gmra.mxu1 %v948_v0 }
 0x46a   :  { %v902_v19 = vadd.f32 %v2351_v38, %v901_v18  ;;  %v940_v20 = vmax.f32 %v910_v15, 0.0  ;;  %2860 = vmatpush3.bf16.msra.mxu1 %v3110_v32  ;;  %v3333_v32 = vld [vmem:[%s3416_s1 + $0x18] sm:$0xff]  }
 0x46b   :  { %v2789_v2 = vpop.f32.mrf.mxu0  ;;  %2861 = vmatprep.subr.bf16.mxu1 %v3111_v33 }
 0x46c   :  { %v938_v6 = vmax.f32 %v902_v19, 0.0  ;;  %v950_v10 = vpack.c.bf16 %v940_v20, %v939_v7  ;;  %v923_v16 = vadd.f32 %v2789_v2, %v2351_v38 }
 0x46d   :  { %v914_v8 = vpop.f32.mrf.mxu0 }
 0x46e   :  { %v949_v9 = vpack.c.bf16 %v938_v6, %v937_v5  ;;  %v915_v12 = vadd.f32 %v2351_v38, %v914_v8  ;;  %v943_v27 = vmax.f32 %v923_v16, 0.0  ;;  %2862 = vmatpush3.bf16.msra.mxu1 %v3111_v33  ;;  %v3339_v33 = vld [vmem:[%s3416_s1 + $0x20] sm:$0xff]  }
 0x46f   :  { %v2790_v11 = vpop.f32.mrf.mxu0  ;;  %2863 = vmatprep.subr.bf16.mxu1 %v3112_v34 }
 0x470   :  { %v926_v13 = vadd.f32 %v2790_v11, %v2351_v38  ;;  %2815 = vmatprep.mubr.bf16.mxu1 %v949_v9  ;;  %v941_v25 = vmax.f32 %v915_v12, 0.0 }
 0x471   :  { %v917_v22 = vpop.f32.mrf.mxu0  ;;  %2816 = vmatmul.mubr.bf16.gmra.mxu1 %v950_v10 }
 0x472   :  { %v918_v23 = vadd.f32 %v2351_v38, %v917_v22  ;;  %v944_v24 = vmax.f32 %v926_v13, 0.0  ;;  %2864 = vmatpush3.bf16.msra.mxu1 %v3112_v34  ;;  %v3345_v34 = vld [vmem:[%s3416_s1 + $0x28] sm:$0xff]  }
 0x473   :  { %2865 = vmatprep.subr.bf16.mxu1 %v3113_v35 }
 0x474   :  { %v942_v26 = vmax.f32 %v918_v23, 0.0  ;;  %v952_v29 = vpack.c.bf16 %v944_v24, %v943_v27 }
 0x476   :  { %v951_v28 = vpack.c.bf16 %v942_v26, %v941_v25  ;;  %2866 = vmatpush3.bf16.msra.mxu1 %v3113_v35  ;;  %v3351_v35 = vld [vmem:[%s3416_s1 + $0x30] sm:$0xff]  }
 0x478   :  { %2819 = vmatprep.mubr.bf16.mxu1 %v951_v28 }
 0x479   :  { %2820 = vmatmul.mubr.bf16.gmra.mxu1 %v952_v29 }
 0x521   :  { %v2809_v36 = vpop.f32.mrf.mxu1 }
 0x522   :  { %v1069_v12 = vadd.f32 %v2809_v36, %v2361_v48  ;;  %v3114_v36 = vld [vmem:[#allocation2 + $0x108] sm:$0xff]  }
 0x523   :  { %v1060_v37 = vpop.f32.mrf.mxu1  ;;  %2867 = vmatprep.subr.bf16.mxu1 %v3114_v36 }
 0x524   :  { %v1125_v24 = vmax.f32 %v1069_v12, 0.0  ;;  %v1061_v25 = vadd.f32 %v2361_v48, %v1060_v37  ;;  %2868 = vmatpush3.bf16.msra.mxu1 %v3114_v36  ;;  %v3115_v37 = vld [vmem:[#allocation2 + $0x100] sm:$0xff]  }
 0x525   :  { %v2810_v38 = vpop.f32.mrf.mxu1  ;;  %2869 = vmatprep.subr.bf16.mxu1 %v3115_v37 }
 0x526   :  { %v1072_v9 = vadd.f32 %v2810_v38, %v2361_v48  ;;  %v1123_v28 = vmax.f32 %v1061_v25, 0.0  ;;  %v3116_v38 = vld [vmem:[#allocation2 + $0x178] sm:$0xff]  }
 0x527   :  { %v1063_v39 = vpop.f32.mrf.mxu1 }
 0x528   :  { %v1126_v16 = vmax.f32 %v1072_v9, 0.0  ;;  %v1064_v22 = vadd.f32 %v2361_v48, %v1063_v39  ;;  %2870 = vmatpush3.bf16.msra.mxu1 %v3115_v37  ;;  %v3117_v39 = vld [vmem:[#allocation2 + $0x170] sm:$0xff]  }
 0x529   :  { %v2813_v40 = vpop.f32.mrf.mxu1 }
 0x52a   :  { %v1085_v19 = vadd.f32 %v2813_v40, %v2361_v48  ;;  %v1140_v26 = vpack.c.bf16 %v1126_v16, %v1125_v24  ;;  %v1124_v27 = vmax.f32 %v1064_v22, 0.0  ;;  %v3118_v40 = vld [vmem:[#allocation2 + $0x168] sm:$0xff]  }
 0x52b   :  { %v1076_v41 = vpop.f32.mrf.mxu1 }
 0x52c   :  { %v1129_v7 = vmax.f32 %v1085_v19, 0.0  ;;  %v1077_v8 = vadd.f32 %v2361_v48, %v1076_v41  ;;  %v1139_v29 = vpack.c.bf16 %v1124_v27, %v1123_v28  ;;  %v3119_v41 = vld [vmem:[#allocation2 + $0x160] sm:$0xff]  }
 0x52d   :  { %v2814_v42 = vpop.f32.mrf.mxu1  ;;  %v2371_v19 = vld [vmem:[%s3419_s4 + $0x4] ss:$0 sm:$0xff] }
 0x52e   :  { %v1088_v15 = vadd.f32 %v2814_v42, %v2361_v48  ;;  %v1127_v13 = vmax.f32 %v1077_v8, 0.0  ;;  %v3120_v42 = vld [vmem:[#allocation2 + $0x158] sm:$0xff]  }
 0x52f   :  { %v1079_v4 = vpop.f32.mrf.mxu1 }
 0x530   :  { %v1130_v2 = vmax.f32 %v1088_v15, 0.0  ;;  %v1080_v5 = vadd.f32 %v2361_v48, %v1079_v4  ;;  %v3123_v15 = vld [vmem:[#allocation2 + $0x140] sm:$0xff]  }
 0x531   :  { %v2817_v43 = vpop.f32.mrf.mxu1 }
 0x532   :  { %v1101_v60 = vadd.f32 %v2817_v43, %v2361_v48  ;;  %v1142_v10 = vpack.c.bf16 %v1130_v2, %v1129_v7  ;;  %v1128_v11 = vmax.f32 %v1080_v5, 0.0 }
 0x533   :  { %v1092_v44 = vpop.f32.mrf.mxu1 }
 0x534   :  { %v1133_v1 = vmax.f32 %v1101_v60, 0.0  ;;  %v1093_v14 = vadd.f32 %v2361_v48, %v1092_v44  ;;  %v1141_v23 = vpack.c.bf16 %v1128_v11, %v1127_v13 }
 0x535   :  { %v2818_v45 = vpop.f32.mrf.mxu1 }
 0x536   :  { %v1104_v55 = vadd.f32 %v2818_v45, %v2361_v48  ;;  %v1131_v20 = vmax.f32 %v1093_v14, 0.0  ;;  %v3122_v14 = vld [vmem:[#allocation2 + $0x148] sm:$0xff]  }
 0x537   :  { %v1095_v46 = vpop.f32.mrf.mxu1 }
 0x538   :  { %v1134_v3 = vmax.f32 %v1104_v55, 0.0  ;;  %v1096_v63 = vadd.f32 %v2361_v48, %v1095_v46 }
 0x539   :  { %v2821_v47 = vpop.f32.mrf.mxu1 }
 0x53a   :  { %v1117_v50 = vadd.f32 %v2821_v47, %v2361_v48  ;;  %v1144_v17 = vpack.c.bf16 %v1134_v3, %v1133_v1  ;;  %v1132_v18 = vmax.f32 %v1096_v63, 0.0  ;;  %v3121_v1 = vld [vmem:[#allocation2 + $0x150] sm:$0xff]  }
 0x53b   :  { %v1108_v49 = vpop.f32.mrf.mxu1 }
 0x53c   :  { %v1109_v52 = vadd.f32 %v2361_v48, %v1108_v49  ;;  %v1137_v56 = vmax.f32 %v1117_v50, 0.0  ;;  %v1143_v6 = vpack.c.bf16 %v1132_v18, %v1131_v20 }
 0x53d   :  { %v2822_v51 = vpop.f32.mrf.mxu1 }
 0x53e   :  { %v1120_v53 = vadd.f32 %v2822_v51, %v2361_v48  ;;  %v1135_v61 = vmax.f32 %v1109_v52, 0.0 }
 0x53f   :  { %v1111_v54 = vpop.f32.mrf.mxu1 }
 0x540   :  { %v1138_v57 = vmax.f32 %v1120_v53, 0.0  ;;  %v1112_v59 = vadd.f32 %v2361_v48, %v1111_v54 }
 0x542   :  { %v1146_v58 = vpack.c.bf16 %v1138_v57, %v1137_v56  ;;  %v1136_v62 = vmax.f32 %v1112_v59, 0.0 }
 0x544   :  { %v1145_v0 = vpack.c.bf16 %v1136_v62, %v1135_v61  ;;  %2823 = vmatprep.subr.bf16.mxu0 %v1146_v58 }
 0x545   :  { %2824 = vmatpush3.bf16.msra.mxu0 %v1146_v58 }
 0x546   :  { %2825 = vmatprep.subr.bf16.mxu0 %v1145_v0 }
 0x549   :  { %2826 = vmatpush3.bf16.msra.mxu0 %v1145_v0  ;;  %v3163_v0 = vld [vmem:[%s3416_s1] sm:$0xff]  }
 0x54a   :  { %2827 = vmatprep.subr.bf16.mxu0 %v1144_v17 }
 0x54d   :  { %2828 = vmatpush3.bf16.msra.mxu0 %v1144_v17 }
 0x54e   :  { %2829 = vmatprep.subr.bf16.mxu0 %v1143_v6 }
 0x551   :  { %2830 = vmatpush3.bf16.msra.mxu0 %v1143_v6 }
 0x552   :  { %2831 = vmatprep.subr.bf16.mxu0 %v1142_v10 }
 0x555   :  { %2832 = vmatpush3.bf16.msra.mxu0 %v1142_v10 }
 0x556   :  { %2833 = vmatprep.subr.bf16.mxu0 %v1141_v23 }
 0x559   :  { %2834 = vmatpush3.bf16.msra.mxu0 %v1141_v23 }
 0x55a   :  { %2835 = vmatprep.subr.bf16.mxu0 %v1140_v26 }
 0x55d   :  { %2836 = vmatpush3.bf16.msra.mxu0 %v1140_v26 }
 0x55e   :  { %2837 = vmatprep.subr.bf16.mxu0 %v1139_v29 }
 0x561   :  { %2838 = vmatpush3.bf16.msra.mxu0 %v1139_v29 }
 0x562   :  { %2887 = vmatprep.subr.bf16.mxu0 %v3116_v38 }
 0x564   :  { %2840 = vmatmul.mubr.bf16.vlgmr.msra.gmra.mxu0 %v3321_v30 }
 0x565   :  { %2843 = vmatprep.mubr.bf16.mxu0 %v3327_v31  ;;  %2888 = vmatpush3.bf16.msra.mxu0 %v3116_v38 }
 0x566   :  { %2889 = vmatprep.subr.bf16.mxu0 %v3117_v39 }
 0x569   :  { %2890 = vmatpush3.bf16.msra.mxu0 %v3117_v39 }
 0x56a   :  { %2891 = vmatprep.subr.bf16.mxu0 %v3118_v40 }
 0x56c   :  { %2844 = vmatmul.mubr.bf16.gmra.mxu0 %v3333_v32 }
 0x56d   :  { %2847 = vmatprep.mubr.bf16.mxu0 %v3339_v33  ;;  %2892 = vmatpush3.bf16.msra.mxu0 %v3118_v40 }
 0x56e   :  { %2893 = vmatprep.subr.bf16.mxu0 %v3119_v41 }
 0x571   :  { %2894 = vmatpush3.bf16.msra.mxu0 %v3119_v41 }
 0x572   :  { %2895 = vmatprep.subr.bf16.mxu0 %v3120_v42 }
 0x574   :  { %2848 = vmatmul.mubr.bf16.gmra.mxu0 %v3345_v34 }
 0x575   :  { %2851 = vmatprep.mubr.bf16.mxu0 %v3351_v35  ;;  %2896 = vmatpush3.bf16.msra.mxu0 %v3120_v42 }
 0x576   :  { %2897 = vmatprep.subr.bf16.mxu0 %v3121_v1 }
 0x579   :  { %2898 = vmatpush3.bf16.msra.mxu0 %v3121_v1 }
 0x57a   :  { %2899 = vmatprep.subr.bf16.mxu0 %v3122_v14 }
 0x57c   :  { %2852 = vmatmul.mubr.bf16.gmra.mxu0 %v3294_v21 }
 0x57d   :  { %2900 = vmatpush3.bf16.msra.mxu0 %v3122_v14 }
 0x57e   :  { %2901 = vmatprep.subr.bf16.mxu0 %v3123_v15 }
 0x581   :  { %2902 = vmatpush3.bf16.msra.mxu0 %v3123_v15  ;;  %v3124_v15 = vld [vmem:[#allocation2 + $0x1b8] sm:$0xff]  }
 0x582   :  { %2951 = vmatprep.subr.bf16.mxu0 %v3124_v15 }
 0x624   :  { %v2841_v21 = vpop.f32.mrf.mxu0 }
 0x626   :  { %v1181_v4 = vpop.f32.mrf.mxu0 }
 0x628   :  { %v2842_v43 = vpop.f32.mrf.mxu0 }
 0x629   :  { %v1245_v46 = vpack.c.bf16 %v2842_v43, %v2841_v21 }
 0x62a   :  { %v1184_v44 = vpop.f32.mrf.mxu0 }
 0x62b   :  { %v1244_v45 = vpack.c.bf16 %v1184_v44, %v1181_v4 }
 0x62c   :  { %v2845_v47 = vpop.f32.mrf.mxu0 }
 0x62d   :  { %2871 = vmatprep.mubr.bf16.mxu1 %v1244_v45 }
 0x62e   :  { %v1197_v48 = vpop.f32.mrf.mxu0  ;;  %2872 = vmatmul.mubr.bf16.vlgmr.msra.gmra.mxu1 %v1245_v46 }
 0x630   :  { %v2846_v49 = vpop.f32.mrf.mxu0 }
 0x631   :  { %v1247_v52 = vpack.c.bf16 %v2846_v49, %v2845_v47 }
 0x632   :  { %v1200_v50 = vpop.f32.mrf.mxu0 }
 0x633   :  { %v1246_v51 = vpack.c.bf16 %v1200_v50, %v1197_v48 }
 0x634   :  { %v2849_v53 = vpop.f32.mrf.mxu0 }
 0x635   :  { %2875 = vmatprep.mubr.bf16.mxu1 %v1246_v51 }
 0x636   :  { %v1213_v54 = vpop.f32.mrf.mxu0  ;;  %2876 = vmatmul.mubr.bf16.gmra.mxu1 %v1247_v52 }
 0x638   :  { %v2850_v55 = vpop.f32.mrf.mxu0 }
 0x639   :  { %v1249_v59 = vpack.c.bf16 %v2850_v55, %v2849_v53 }
 0x63a   :  { %v1216_v56 = vpop.f32.mrf.mxu0 }
 0x63b   :  { %v1248_v57 = vpack.c.bf16 %v1216_v56, %v1213_v54 }
 0x63c   :  { %v2853_v60 = vpop.f32.mrf.mxu0 }
 0x63d   :  { %2879 = vmatprep.mubr.bf16.mxu1 %v1248_v57 }
 0x63e   :  { %v1229_v61 = vpop.f32.mrf.mxu0  ;;  %2880 = vmatmul.mubr.bf16.gmra.mxu1 %v1249_v59 }
 0x640   :  { %v2854_v58 = vpop.f32.mrf.mxu0 }
 0x641   :  { %v1251_v63 = vpack.c.bf16 %v2854_v58, %v2853_v60 }
 0x642   :  { %v1232_v62 = vpop.f32.mrf.mxu0 }
 0x643   :  { %v1250_v3 = vpack.c.bf16 %v1232_v62, %v1229_v61 }
 0x645   :  { %2883 = vmatprep.mubr.bf16.mxu1 %v1250_v3 }
 0x646   :  { %2884 = vmatmul.mubr.bf16.gmra.mxu1 %v1251_v63 }
 0x647   :  { %2935 = vmatprep.mubr.bf16.mxu1 %v3163_v0 }
 0x6ee   :  { %v2873_v17 = vpop.f32.mrf.mxu1 }
 0x6ef   :  { %v1368_v6 = vadd.f32 %v2873_v17, %v2371_v19  ;;  %v3125_v17 = vld [vmem:[#allocation2 + $0x1b0] sm:$0xff]  }
 0x6f0   :  { %v1359_v18 = vpop.f32.mrf.mxu1 }
 0x6f1   :  { %v1360_v2 = vadd.f32 %v2371_v19, %v1359_v18  ;;  %v1424_v13 = vmax.f32 %v1368_v6, 0.0  ;;  %v3126_v18 = vld [vmem:[#allocation2 + $0x1a8] sm:$0xff]  }
 0x6f2   :  { %v2874_v20 = vpop.f32.mrf.mxu1 }
 0x6f3   :  { %v1371_v5 = vadd.f32 %v2874_v20, %v2371_v19  ;;  %v1422_v11 = vmax.f32 %v1360_v2, 0.0  ;;  %v3127_v20 = vld [vmem:[#allocation2 + $0x1a0] sm:$0xff]   ;;  %v3129_v2 = vld [vmem:[#allocation2 + $0x190] sm:$0xff]  }
 0x6f4   :  { %v1362_v7 = vpop.f32.mrf.mxu1 }
 0x6f5   :  { %v1363_v8 = vadd.f32 %v2371_v19, %v1362_v7  ;;  %v1425_v9 = vmax.f32 %v1371_v5, 0.0 }
 0x6f6   :  { %v2877_v10 = vpop.f32.mrf.mxu1 }
 0x6f7   :  { %v1423_v12 = vmax.f32 %v1363_v8, 0.0  ;;  %v1439_v23 = vpack.c.bf16 %v1425_v9, %v1424_v13  ;;  %v1384_v27 = vadd.f32 %v2877_v10, %v2371_v19 }
 0x6f8   :  { %v1375_v16 = vpop.f32.mrf.mxu1 }
 0x6f9   :  { %v1438_v22 = vpack.c.bf16 %v1423_v12, %v1422_v11  ;;  %v1376_v25 = vadd.f32 %v2371_v19, %v1375_v16  ;;  %v1428_v40 = vmax.f32 %v1384_v27, 0.0 }
 0x6fa   :  { %v2878_v24 = vpop.f32.mrf.mxu1 }
 0x6fb   :  { %v1387_v26 = vadd.f32 %v2878_v24, %v2371_v19  ;;  %2903 = vmatprep.mubr.bf16.mxu0 %v1438_v22  ;;  %v1426_v38 = vmax.f32 %v1376_v25, 0.0  ;;  %v2381_v25 = vld [vmem:[%s3419_s4 + $0x5] ss:$0 sm:$0xff] }
 0x6fc   :  { %v1378_v28 = vpop.f32.mrf.mxu1  ;;  %2904 = vmatmul.mubr.bf16.vlgmr.msra.gmra.mxu0 %v1439_v23 }
 0x6fd   :  { %v1379_v29 = vadd.f32 %v2371_v19, %v1378_v28  ;;  %v1429_v36 = vmax.f32 %v1387_v26, 0.0  ;;  %2952 = vmatpush3.bf16.msra.mxu0 %v3124_v15 }
 0x6fe   :  { %v2881_v37 = vpop.f32.mrf.mxu1  ;;  %2953 = vmatprep.subr.bf16.mxu0 %v3125_v17 }
 0x6ff   :  { %v1427_v39 = vmax.f32 %v1379_v29, 0.0  ;;  %v1441_v21 = vpack.c.bf16 %v1429_v36, %v1428_v40  ;;  %v1400_v45 = vadd.f32 %v2881_v37, %v2371_v19 }
 0x700   :  { %v1391_v41 = vpop.f32.mrf.mxu1 }
 0x701   :  { %v1440_v42 = vpack.c.bf16 %v1427_v39, %v1426_v38  ;;  %v1392_v43 = vadd.f32 %v2371_v19, %v1391_v41  ;;  %v1432_v52 = vmax.f32 %v1400_v45, 0.0  ;;  %2954 = vmatpush3.bf16.msra.mxu0 %v3125_v17 }
 0x702   :  { %v2882_v4 = vpop.f32.mrf.mxu1  ;;  %2955 = vmatprep.subr.bf16.mxu0 %v3126_v18 }
 0x703   :  { %v1403_v44 = vadd.f32 %v2882_v4, %v2371_v19  ;;  %2907 = vmatprep.mubr.bf16.mxu0 %v1440_v42  ;;  %v1430_v50 = vmax.f32 %v1392_v43, 0.0 }
 0x704   :  { %v1394_v46 = vpop.f32.mrf.mxu1  ;;  %2908 = vmatmul.mubr.bf16.gmra.mxu0 %v1441_v21 }
 0x705   :  { %v1395_v47 = vadd.f32 %v2371_v19, %v1394_v46  ;;  %v1433_v48 = vmax.f32 %v1403_v44, 0.0  ;;  %2956 = vmatpush3.bf16.msra.mxu0 %v3126_v18 }
 0x706   :  { %v2885_v49 = vpop.f32.mrf.mxu1  ;;  %2957 = vmatprep.subr.bf16.mxu0 %v3127_v20 }
 0x707   :  { %v1431_v51 = vmax.f32 %v1395_v47, 0.0  ;;  %v1443_v55 = vpack.c.bf16 %v1433_v48, %v1432_v52  ;;  %v1416_v60 = vadd.f32 %v2885_v49, %v2371_v19 }
 0x708   :  { %v1407_v53 = vpop.f32.mrf.mxu1 }
 0x709   :  { %v1442_v54 = vpack.c.bf16 %v1431_v51, %v1430_v50  ;;  %v1408_v57 = vadd.f32 %v2371_v19, %v1407_v53  ;;  %v1436_v0 = vmax.f32 %v1416_v60, 0.0  ;;  %2958 = vmatpush3.bf16.msra.mxu0 %v3127_v20 }
 0x70a   :  { %v2886_v56 = vpop.f32.mrf.mxu1 }
 0x70b   :  { %v1419_v59 = vadd.f32 %v2886_v56, %v2371_v19  ;;  %2911 = vmatprep.mubr.bf16.mxu0 %v1442_v54  ;;  %v1434_v3 = vmax.f32 %v1408_v57, 0.0 }
 0x70c   :  { %v1410_v61 = vpop.f32.mrf.mxu1  ;;  %2912 = vmatmul.mubr.bf16.gmra.mxu0 %v1443_v55 }
 0x70d   :  { %v1411_v58 = vadd.f32 %v2371_v19, %v1410_v61  ;;  %v1437_v62 = vmax.f32 %v1419_v59, 0.0  ;;  %v3128_v19 = vld [vmem:[#allocation2 + $0x198] sm:$0xff]  }
 0x70e   :  { %2959 = vmatprep.subr.bf16.mxu0 %v3128_v19 }
 0x70f   :  { %v1435_v63 = vmax.f32 %v1411_v58, 0.0  ;;  %v1445_v14 = vpack.c.bf16 %v1437_v62, %v1436_v0  ;;  %2960 = vmatpush3.bf16.msra.mxu0 %v3128_v19 }
 0x710   :  { %2961 = vmatprep.subr.bf16.mxu0 %v3129_v2 }
 0x711   :  { %v1444_v1 = vpack.c.bf16 %v1435_v63, %v1434_v3 }
 0x713   :  { %2915 = vmatprep.mubr.bf16.mxu0 %v1444_v1  ;;  %2962 = vmatpush3.bf16.msra.mxu0 %v3129_v2  ;;  %v3164_v2 = vld [vmem:[%s3416_s1 + $0x38] sm:$0xff]  }
 0x714   :  { %2916 = vmatmul.mubr.bf16.gmra.mxu0 %v1445_v14 }
 0x7bc   :  { %v2905_v5 = vpop.f32.mrf.mxu0 }
 0x7bd   :  { %v1562_v62 = vadd.f32 %v2905_v5, %v2381_v25  ;;  %v3130_v5 = vld [vmem:[#allocation2 + $0x188] sm:$0xff]  }
 0x7be   :  { %v1553_v6 = vpop.f32.mrf.mxu0  ;;  %2963 = vmatprep.subr.bf16.mxu0 %v3130_v5 }
 0x7bf   :  { %v1618_v14 = vmax.f32 %v1562_v62, 0.0  ;;  %v1554_v15 = vadd.f32 %v2381_v25, %v1553_v6  ;;  %2964 = vmatpush3.bf16.msra.mxu0 %v3130_v5  ;;  %v3131_v6 = vld [vmem:[#allocation2 + $0x180] sm:$0xff]  }
 0x7c0   :  { %v2906_v7 = vpop.f32.mrf.mxu0  ;;  %2965 = vmatprep.subr.bf16.mxu0 %v3131_v6 }
 0x7c1   :  { %v1565_v60 = vadd.f32 %v2906_v7, %v2381_v25  ;;  %v1616_v20 = vmax.f32 %v1554_v15, 0.0 }
 0x7c2   :  { %v1556_v8 = vpop.f32.mrf.mxu0 }
 0x7c3   :  { %v1619_v63 = vmax.f32 %v1565_v60, 0.0  ;;  %v1557_v0 = vadd.f32 %v2381_v25, %v1556_v8  ;;  %2966 = vmatpush3.bf16.msra.mxu0 %v3131_v6 }
 0x7c4   :  { %v2909_v9 = vpop.f32.mrf.mxu0 }
 0x7c5   :  { %v1578_v52 = vadd.f32 %v2909_v9, %v2381_v25  ;;  %v1633_v17 = vpack.c.bf16 %v1619_v63, %v1618_v14  ;;  %v1617_v18 = vmax.f32 %v1557_v0, 0.0 }
 0x7c6   :  { %v1569_v10 = vpop.f32.mrf.mxu0 }
 0x7c7   :  { %v1622_v57 = vmax.f32 %v1578_v52, 0.0  ;;  %v1570_v59 = vadd.f32 %v2381_v25, %v1569_v10  ;;  %v1632_v19 = vpack.c.bf16 %v1617_v18, %v1616_v20 }
 0x7c8   :  { %v2910_v11 = vpop.f32.mrf.mxu0 }
 0x7c9   :  { %v1581_v49 = vadd.f32 %v2910_v11, %v2381_v25  ;;  %v1620_v3 = vmax.f32 %v1570_v59, 0.0 }
 0x7ca   :  { %v1572_v12 = vpop.f32.mrf.mxu0 }
 0x7cb   :  { %v1623_v54 = vmax.f32 %v1581_v49, 0.0  ;;  %v1573_v55 = vadd.f32 %v2381_v25, %v1572_v12 }
 0x7cc   :  { %v2913_v13 = vpop.f32.mrf.mxu0 }
 0x7cd   :  { %v1594_v42 = vadd.f32 %v2913_v13, %v2381_v25  ;;  %v1635_v61 = vpack.c.bf16 %v1623_v54, %v1622_v57  ;;  %v1621_v58 = vmax.f32 %v1573_v55, 0.0 }
 0x7ce   :  { %v1585_v16 = vpop.f32.mrf.mxu0 }
 0x7cf   :  { %v1626_v47 = vmax.f32 %v1594_v42, 0.0  ;;  %v1586_v48 = vadd.f32 %v2381_v25, %v1585_v16  ;;  %v1634_v1 = vpack.c.bf16 %v1621_v58, %v1620_v3 }
 0x7d0   :  { %v2914_v22 = vpop.f32.mrf.mxu0 }
 0x7d1   :  { %v1597_v38 = vadd.f32 %v2914_v22, %v2381_v25  ;;  %v1624_v53 = vmax.f32 %v1586_v48, 0.0 }
 0x7d2   :  { %v1588_v23 = vpop.f32.mrf.mxu0 }
 0x7d3   :  { %v1627_v44 = vmax.f32 %v1597_v38, 0.0  ;;  %v1589_v45 = vadd.f32 %v2381_v25, %v1588_v23 }
 0x7d4   :  { %v2917_v24 = vpop.f32.mrf.mxu0 }
 0x7d5   :  { %v1610_v27 = vadd.f32 %v2917_v24, %v2381_v25  ;;  %v1637_v50 = vpack.c.bf16 %v1627_v44, %v1626_v47  ;;  %v1625_v51 = vmax.f32 %v1589_v45, 0.0 }
 0x7d6   :  { %v1601_v26 = vpop.f32.mrf.mxu0 }
 0x7d7   :  { %v1602_v29 = vadd.f32 %v2381_v25, %v1601_v26  ;;  %v1630_v39 = vmax.f32 %v1610_v27, 0.0  ;;  %v1636_v56 = vpack.c.bf16 %v1625_v51, %v1624_v53 }
 0x7d8   :  { %v2918_v28 = vpop.f32.mrf.mxu0 }
 0x7d9   :  { %v1613_v36 = vadd.f32 %v2918_v28, %v2381_v25  ;;  %v1628_v21 = vmax.f32 %v1602_v29, 0.0 }
 0x7da   :  { %v1604_v37 = vpop.f32.mrf.mxu0 }
 0x7db   :  { %v1631_v40 = vmax.f32 %v1613_v36, 0.0  ;;  %v1605_v41 = vadd.f32 %v2381_v25, %v1604_v37 }
 0x7dd   :  { %v1639_v4 = vpack.c.bf16 %v1631_v40, %v1630_v39  ;;  %v1629_v43 = vmax.f32 %v1605_v41, 0.0 }
 0x7df   :  { %v1638_v46 = vpack.c.bf16 %v1629_v43, %v1628_v21  ;;  %2919 = vmatprep.subr.bf16.mxu1 %v1639_v4  ;;  %v3137_v21 = vld [vmem:[#allocation2 + $0x1d0] sm:$0xff]   ;;  %v3139_v43 = vld [vmem:[#allocation2 + $0x1c0] sm:$0xff]  }
 0x7e0   :  { %2920 = vmatpush3.bf16.msra.mxu1 %v1639_v4  ;;  %v3138_v4 = vld [vmem:[#allocation2 + $0x1c8] sm:$0xff]  }
 0x7e1   :  { %2921 = vmatprep.subr.bf16.mxu1 %v1638_v46 }
 0x7e4   :  { %2922 = vmatpush3.bf16.msra.mxu1 %v1638_v46  ;;  %v2391_v46 = vld [vmem:[%s3419_s4 + $0x6] ss:$0 sm:$0xff] }
 0x7e5   :  { %2923 = vmatprep.subr.bf16.mxu1 %v1637_v50 }
 0x7e8   :  { %2924 = vmatpush3.bf16.msra.mxu1 %v1637_v50 }
 0x7e9   :  { %2925 = vmatprep.subr.bf16.mxu1 %v1636_v56 }
 0x7ec   :  { %2926 = vmatpush3.bf16.msra.mxu1 %v1636_v56 }
 0x7ed   :  { %2927 = vmatprep.subr.bf16.mxu1 %v1635_v61 }
 0x7f0   :  { %2928 = vmatpush3.bf16.msra.mxu1 %v1635_v61 }
 0x7f1   :  { %2929 = vmatprep.subr.bf16.mxu1 %v1634_v1 }
 0x7f4   :  { %2930 = vmatpush3.bf16.msra.mxu1 %v1634_v1 }
 0x7f5   :  { %2931 = vmatprep.subr.bf16.mxu1 %v1633_v17 }
 0x7f8   :  { %2932 = vmatpush3.bf16.msra.mxu1 %v1633_v17 }
 0x7f9   :  { %2933 = vmatprep.subr.bf16.mxu1 %v1632_v19 }
 0x7fc   :  { %2934 = vmatpush3.bf16.msra.mxu1 %v1632_v19 }
 0x7ff   :  { %2936 = vmatmul.mubr.bf16.vlgmr.msra.gmra.mxu1 %v3321_v30  ;;  %v3132_v30 = vld [vmem:[#allocation2 + $0x1f8] sm:$0xff]  }
 0x800   :  { %2939 = vmatprep.mubr.bf16.mxu1 %v3327_v31  ;;  %v3133_v31 = vld [vmem:[#allocation2 + $0x1f0] sm:$0xff]   ;;  %2983 = vmatprep.subr.bf16.mxu1 %v3132_v30 }
 0x801   :  { %2984 = vmatpush3.bf16.msra.mxu1 %v3132_v30 }
 0x802   :  { %2985 = vmatprep.subr.bf16.mxu1 %v3133_v31 }
 0x805   :  { %2986 = vmatpush3.bf16.msra.mxu1 %v3133_v31 }
 0x807   :  { %2940 = vmatmul.mubr.bf16.gmra.mxu1 %v3333_v32  ;;  %v3134_v32 = vld [vmem:[#allocation2 + $0x1e8] sm:$0xff]  }
 0x808   :  { %2943 = vmatprep.mubr.bf16.mxu1 %v3339_v33  ;;  %2987 = vmatprep.subr.bf16.mxu1 %v3134_v32  ;;  %v3135_v33 = vld [vmem:[#allocation2 + $0x1e0] sm:$0xff]  }
 0x809   :  { %2988 = vmatpush3.bf16.msra.mxu1 %v3134_v32 }
 0x80a   :  { %2989 = vmatprep.subr.bf16.mxu1 %v3135_v33 }
 0x80d   :  { %2990 = vmatpush3.bf16.msra.mxu1 %v3135_v33 }
 0x80f   :  { %2944 = vmatmul.mubr.bf16.gmra.mxu1 %v3345_v34  ;;  %v3136_v34 = vld [vmem:[#allocation2 + $0x1d8] sm:$0xff]  }
 0x810   :  { %2947 = vmatprep.mubr.bf16.mxu1 %v3351_v35  ;;  %2991 = vmatprep.subr.bf16.mxu1 %v3136_v34 }
 0x811   :  { %2992 = vmatpush3.bf16.msra.mxu1 %v3136_v34 }
 0x812   :  { %2993 = vmatprep.subr.bf16.mxu1 %v3137_v21 }
 0x815   :  { %2994 = vmatpush3.bf16.msra.mxu1 %v3137_v21  ;;  %v3144_v21 = vld [vmem:[#allocation2 + $0x220] sm:$0xff]  }
 0x816   :  { %2995 = vmatprep.subr.bf16.mxu1 %v3138_v4 }
 0x817   :  { %2948 = vmatmul.mubr.bf16.gmra.mxu1 %v3164_v2 }
 0x819   :  { %2996 = vmatpush3.bf16.msra.mxu1 %v3138_v4  ;;  %v3145_v4 = vld [vmem:[#allocation2 + $0x218] sm:$0xff]  }
 0x81a   :  { %2997 = vmatprep.subr.bf16.mxu1 %v3139_v43 }
 0x81d   :  { %2998 = vmatpush3.bf16.msra.mxu1 %v3139_v43  ;;  %v3146_v43 = vld [vmem:[#allocation2 + $0x210] sm:$0xff]  }
 0x8bf   :  { %v2937_v35 = vpop.f32.mrf.mxu1 }
 0x8c1   :  { %v1674_v7 = vpop.f32.mrf.mxu1 }
 0x8c3   :  { %v2938_v8 = vpop.f32.mrf.mxu1 }
 0x8c4   :  { %v1738_v11 = vpack.c.bf16 %v2938_v8, %v2937_v35 }
 0x8c5   :  { %v1677_v9 = vpop.f32.mrf.mxu1 }
 0x8c6   :  { %v1737_v10 = vpack.c.bf16 %v1677_v9, %v1674_v7 }
 0x8c7   :  { %v2941_v12 = vpop.f32.mrf.mxu1 }
 0x8c8   :  { %2967 = vmatprep.mubr.bf16.mxu0 %v1737_v10 }
 0x8c9   :  { %v1690_v13 = vpop.f32.mrf.mxu1  ;;  %2968 = vmatmul.mubr.bf16.vlgmr.msra.gmra.mxu0 %v1738_v11 }
 0x8cb   :  { %v2942_v16 = vpop.f32.mrf.mxu1 }
 0x8cc   :  { %v1740_v24 = vpack.c.bf16 %v2942_v16, %v2941_v12 }
 0x8cd   :  { %v1693_v22 = vpop.f32.mrf.mxu1 }
 0x8ce   :  { %v1739_v23 = vpack.c.bf16 %v1693_v22, %v1690_v13 }
 0x8cf   :  { %v2945_v25 = vpop.f32.mrf.mxu1 }
 0x8d0   :  { %2971 = vmatprep.mubr.bf16.mxu0 %v1739_v23 }
 0x8d1   :  { %v1706_v26 = vpop.f32.mrf.mxu1  ;;  %2972 = vmatmul.mubr.bf16.gmra.mxu0 %v1740_v24 }
 0x8d3   :  { %v2946_v27 = vpop.f32.mrf.mxu1 }
 0x8d4   :  { %v1742_v36 = vpack.c.bf16 %v2946_v27, %v2945_v25 }
 0x8d5   :  { %v1709_v28 = vpop.f32.mrf.mxu1 }
 0x8d6   :  { %v1741_v29 = vpack.c.bf16 %v1709_v28, %v1706_v26 }
 0x8d7   :  { %v2949_v37 = vpop.f32.mrf.mxu1 }
 0x8d8   :  { %2975 = vmatprep.mubr.bf16.mxu0 %v1741_v29 }
 0x8d9   :  { %v1722_v38 = vpop.f32.mrf.mxu1  ;;  %2976 = vmatmul.mubr.bf16.gmra.mxu0 %v1742_v36 }
 0x8db   :  { %v2950_v39 = vpop.f32.mrf.mxu1 }
 0x8dc   :  { %v1744_v42 = vpack.c.bf16 %v2950_v39, %v2949_v37  ;;  %v3190_v39 = vmov 0.0  }
 0x8dd   :  { %v1725_v40 = vpop.f32.mrf.mxu1  ;;  %3015 = vmatprep.subr.bf16.mxu0 %v3190_v39  ;;  %3035 = vmatprep.subr.bf16.mxu1 %v3190_v39 }
 0x8de   :  { %v1743_v41 = vpack.c.bf16 %v1725_v40, %v1722_v38  ;;  %v3141_v40 = vld [vmem:[#allocation2 + $0x238] sm:$0xff]  }
 0x8e0   :  { %2979 = vmatprep.mubr.bf16.mxu0 %v1743_v41  ;;  %v3142_v41 = vld [vmem:[#allocation2 + $0x230] sm:$0xff]  }
 0x8e1   :  { %2980 = vmatmul.mubr.bf16.gmra.mxu0 %v1744_v42  ;;  %v3143_v42 = vld [vmem:[#allocation2 + $0x228] sm:$0xff]  }
 0x8e2   :  { %3031 = vmatprep.mubr.msk.bf16.mxu0 %vm3191_vm0, %v3190_v39 }
 0x989   :  { %v2969_v44 = vpop.f32.mrf.mxu0 }
 0x98a   :  { %v1861_v50 = vadd.f32 %v2969_v44, %v2391_v46 }
 0x98b   :  { %v1852_v45 = vpop.f32.mrf.mxu0 }
 0x98c   :  { %v1853_v48 = vadd.f32 %v2391_v46, %v1852_v45  ;;  %v1917_v57 = vmax.f32 %v1861_v50, 0.0 }
 0x98d   :  { %v2970_v47 = vpop.f32.mrf.mxu0 }
 0x98e   :  { %v1864_v49 = vadd.f32 %v2970_v47, %v2391_v46  ;;  %v1915_v55 = vmax.f32 %v1853_v48, 0.0 }
 0x98f   :  { %v1855_v51 = vpop.f32.mrf.mxu0 }
 0x990   :  { %v1856_v52 = vadd.f32 %v2391_v46, %v1855_v51  ;;  %v1918_v53 = vmax.f32 %v1864_v49, 0.0 }
 0x991   :  { %v2973_v54 = vpop.f32.mrf.mxu0 }
 0x992   :  { %v1916_v56 = vmax.f32 %v1856_v52, 0.0  ;;  %v1932_v61 = vpack.c.bf16 %v1918_v53, %v1917_v57  ;;  %v1877_v63 = vadd.f32 %v2973_v54, %v2391_v46 }
 0x993   :  { %v1868_v59 = vpop.f32.mrf.mxu0 }
 0x994   :  { %v1931_v60 = vpack.c.bf16 %v1916_v56, %v1915_v55  ;;  %v1869_v62 = vadd.f32 %v2391_v46, %v1868_v59  ;;  %v1921_v20 = vmax.f32 %v1877_v63, 0.0  ;;  %v2401_v59 = vld [vmem:[%s3419_s4 + $0x7] ss:$0 sm:$0xff] }
 0x995   :  { %v2974_v58 = vpop.f32.mrf.mxu0 }
 0x996   :  { %v1880_v3 = vadd.f32 %v2974_v58, %v2391_v46  ;;  %2999 = vmatprep.mubr.bf16.mxu1 %v1931_v60  ;;  %v1919_v17 = vmax.f32 %v1869_v62, 0.0 }
 0x997   :  { %v1871_v0 = vpop.f32.mrf.mxu0  ;;  %3000 = vmatmul.mubr.bf16.vlgmr.msra.gmra.mxu1 %v1932_v61 }
 0x998   :  { %v1872_v1 = vadd.f32 %v2391_v46, %v1871_v0  ;;  %v1922_v14 = vmax.f32 %v1880_v3, 0.0  ;;  %3036 = vmatpush3.bf16.msra.mxu1 %v3141_v40 }
 0x999   :  { %v2977_v15 = vpop.f32.mrf.mxu0  ;;  %3037 = vmatprep.subr.bf16.mxu1 %v3190_v39 }
 0x99a   :  { %v1920_v18 = vmax.f32 %v1872_v1, 0.0  ;;  %v1934_v5 = vpack.c.bf16 %v1922_v14, %v1921_v20  ;;  %v1893_v32 = vadd.f32 %v2977_v15, %v2391_v46 }
 0x99b   :  { %v1884_v19 = vpop.f32.mrf.mxu0 }
 0x99c   :  { %v1933_v2 = vpack.c.bf16 %v1920_v18, %v1919_v17  ;;  %v1885_v30 = vadd.f32 %v2391_v46, %v1884_v19  ;;  %v1925_v10 = vmax.f32 %v1893_v32, 0.0  ;;  %3038 = vmatpush3.bf16.msra.mxu1 %v3142_v41 }
 0x99d   :  { %v2978_v6 = vpop.f32.mrf.mxu0  ;;  %3039 = vmatprep.subr.bf16.mxu1 %v3190_v39 }
 0x99e   :  { %v1896_v31 = vadd.f32 %v2978_v6, %v2391_v46  ;;  %3003 = vmatprep.mubr.bf16.mxu1 %v1933_v2  ;;  %v1923_v8 = vmax.f32 %v1885_v30, 0.0 }
 0x99f   :  { %v1887_v33 = vpop.f32.mrf.mxu0  ;;  %3004 = vmatmul.mubr.bf16.gmra.mxu1 %v1934_v5 }
 0x9a0   :  { %v1888_v34 = vadd.f32 %v2391_v46, %v1887_v33  ;;  %v1926_v35 = vmax.f32 %v1896_v31, 0.0  ;;  %3040 = vmatpush3.bf16.msra.mxu1 %v3143_v42 }
 0x9a1   :  { %v2981_v7 = vpop.f32.mrf.mxu0  ;;  %3041 = vmatprep.subr.bf16.mxu1 %v3190_v39 }
 0x9a2   :  { %v1924_v9 = vmax.f32 %v1888_v34, 0.0  ;;  %v1936_v13 = vpack.c.bf16 %v1926_v35, %v1925_v10  ;;  %v1909_v24 = vadd.f32 %v2981_v7, %v2391_v46  ;;  %v3140_v10 = vld [vmem:[%s3417_s2] sm:$0xff]  }
 0x9a3   :  { %v1900_v11 = vpop.f32.mrf.mxu0 }
 0x9a4   :  { %v1935_v12 = vpack.c.bf16 %v1924_v9, %v1923_v8  ;;  %v1901_v22 = vadd.f32 %v2391_v46, %v1900_v11  ;;  %v1929_v36 = vmax.f32 %v1909_v24, 0.0  ;;  %3042 = vmatpush3.bf16.msra.mxu1 %v3144_v21  ;;  %v3147_v11 = vld [vmem:[#allocation2 + $0x208] sm:$0xff]  }
 0x9a5   :  { %v2982_v16 = vpop.f32.mrf.mxu0  ;;  %3043 = vmatprep.subr.bf16.mxu1 %v3190_v39 }
 0x9a6   :  { %v1912_v23 = vadd.f32 %v2982_v16, %v2391_v46  ;;  %3007 = vmatprep.mubr.bf16.mxu1 %v1935_v12  ;;  %v1927_v28 = vmax.f32 %v1901_v22, 0.0  ;;  %v3148_v12 = vld [vmem:[#allocation2 + $0x200] sm:$0xff]  }
 0x9a7   :  { %v1903_v25 = vpop.f32.mrf.mxu0  ;;  %3008 = vmatmul.mubr.bf16.gmra.mxu1 %v1936_v13 }
 0x9a8   :  { %v1904_v26 = vadd.f32 %v2391_v46, %v1903_v25  ;;  %v1930_v27 = vmax.f32 %v1912_v23, 0.0  ;;  %3044 = vmatpush3.bf16.msra.mxu1 %v3145_v4  ;;  %v2281_v25 = vlaneseq }
 0x9a9   :  { %3045 = vmatprep.subr.bf16.mxu1 %v3190_v39 }
 0x9aa   :  { %v1928_v29 = vmax.f32 %v1904_v26, 0.0  ;;  %v1938_v38 = vpack.c.bf16 %v1930_v27, %v1929_v36  ;;  %v2282_v26 = vand.u32 127, %v2281_v25  ;;  %v2412_v27 = vld [vmem:[%s3419_s4 + $0x8] ss:$0 sm:$0xff] }
 0x9ac   :  { %v1937_v37 = vpack.c.bf16 %v1928_v29, %v1927_v28  ;;  %3046 = vmatpush3.bf16.msra.mxu1 %v3146_v43  ;;  %vm2283_vm1 = vcmp.lt.s32.totalorder %v2282_v26, 8 }
 0x9ad   :  { %3047 = vmatprep.subr.bf16.mxu1 %v3190_v39 }
 0x9ae   :  { %3011 = vmatprep.mubr.bf16.mxu1 %v1937_v37 }
 0x9af   :  { %3012 = vmatmul.mubr.bf16.gmra.mxu1 %v1938_v38 }
 0x9b0   :  { %3051 = vmatprep.mubr.msk.bf16.mxu1 %vm3191_vm0, %v3190_v39  ;;  %3048 = vmatpush3.bf16.msra.mxu1 %v3147_v11 }
 0x9b1   :  { %3049 = vmatprep.subr.bf16.mxu1 %v3190_v39 }
 0x9b4   :  { %3050 = vmatpush3.bf16.msra.mxu1 %v3148_v12 }
 0xa57   :  { %v3001_v44 = vpop.f32.mrf.mxu1 }
 0xa58   :  { %v2055_v34 = vadd.f32 %v3001_v44, %v2401_v59 }
 0xa59   :  { %v2046_v45 = vpop.f32.mrf.mxu1 }
 0xa5a   :  { %v2047_v8 = vadd.f32 %v2401_v59, %v2046_v45 }
 0xa5b   :  { %v3002_v46 = vpop.f32.mrf.mxu1 }
 0xa5c   :  { %v2058_v32 = vadd.f32 %v3002_v46, %v2401_v59 }
 0xa5d   :  { %v2049_v47 = vpop.f32.mrf.mxu1 }
 0xa5e   :  { %v2112_v35 = vpack.c.bf16 %v2058_v32, %v2055_v34  ;;  %v2050_v7 = vadd.f32 %v2401_v59, %v2049_v47 }
 0xa5f   :  { %v3005_v48 = vpop.f32.mrf.mxu1 }
 0xa60   :  { %v2071_v5 = vadd.f32 %v3005_v48, %v2401_v59  ;;  %v2111_v9 = vpack.c.bf16 %v2050_v7, %v2047_v8 }
 0xa61   :  { %v2062_v49 = vpop.f32.mrf.mxu1 }
 0xa62   :  { %v2063_v31 = vadd.f32 %v2401_v59, %v2062_v49 }
 0xa63   :  { %v3006_v50 = vpop.f32.mrf.mxu1 }
 0xa64   :  { %v2074_v19 = vadd.f32 %v3006_v50, %v2401_v59 }
 0xa65   :  { %v2065_v51 = vpop.f32.mrf.mxu1 }
 0xa66   :  { %v2114_v6 = vpack.c.bf16 %v2074_v19, %v2071_v5  ;;  %v2066_v30 = vadd.f32 %v2401_v59, %v2065_v51 }
 0xa67   :  { %v3009_v52 = vpop.f32.mrf.mxu1 }
 0xa68   :  { %v2087_v15 = vadd.f32 %v3009_v52, %v2401_v59  ;;  %v2113_v33 = vpack.c.bf16 %v2066_v30, %v2063_v31 }
 0xa69   :  { %v2078_v53 = vpop.f32.mrf.mxu1 }
 0xa6a   :  { %v2079_v20 = vadd.f32 %v2401_v59, %v2078_v53 }
 0xa6b   :  { %v3010_v54 = vpop.f32.mrf.mxu1 }
 0xa6c   :  { %v2090_v1 = vadd.f32 %v3010_v54, %v2401_v59 }
 0xa6d   :  { %v2081_v55 = vpop.f32.mrf.mxu1 }
 0xa6e   :  { %v2116_v17 = vpack.c.bf16 %v2090_v1, %v2087_v15  ;;  %v2082_v18 = vadd.f32 %v2401_v59, %v2081_v55 }
 0xa6f   :  { %v3013_v56 = vpop.f32.mrf.mxu1 }
 0xa70   :  { %v2103_v61 = vadd.f32 %v3013_v56, %v2401_v59  ;;  %v2115_v2 = vpack.c.bf16 %v2082_v18, %v2079_v20 }
 0xa71   :  { %v2094_v57 = vpop.f32.mrf.mxu1 }
 0xa72   :  { %v2095_v0 = vadd.f32 %v2401_v59, %v2094_v57 }
 0xa73   :  { %v3014_v60 = vpop.f32.mrf.mxu1 }
 0xa74   :  { %v2106_v58 = vadd.f32 %v3014_v60, %v2401_v59 }
 0xa75   :  { %v2097_v62 = vpop.f32.mrf.mxu1 }
 0xa76   :  { %v2118_v3 = vpack.c.bf16 %v2106_v58, %v2103_v61  ;;  %v2098_v63 = vadd.f32 %v2401_v59, %v2097_v62 }
 0xa78   :  { %3016 = vmatpush3.bf16.msra.mxu0 %v2118_v3  ;;  %v2117_v14 = vpack.c.bf16 %v2098_v63, %v2095_v0 }
 0xa79   :  { %3017 = vmatprep.subr.bf16.mxu0 %v3190_v39 }
 0xa7c   :  { %3018 = vmatpush3.bf16.msra.mxu0 %v2117_v14 }
 0xa7d   :  { %3019 = vmatprep.subr.bf16.mxu0 %v3190_v39 }
 0xa80   :  { %3020 = vmatpush3.bf16.msra.mxu0 %v2116_v17 }
 0xa81   :  { %3021 = vmatprep.subr.bf16.mxu0 %v3190_v39 }
 0xa84   :  { %3022 = vmatpush3.bf16.msra.mxu0 %v2115_v2 }
 0xa85   :  { %3023 = vmatprep.subr.bf16.mxu0 %v3190_v39 }
 0xa88   :  { %3024 = vmatpush3.bf16.msra.mxu0 %v2114_v6 }
 0xa89   :  { %3025 = vmatprep.subr.bf16.mxu0 %v3190_v39 }
 0xa8c   :  { %3026 = vmatpush3.bf16.msra.mxu0 %v2113_v33 }
 0xa8d   :  { %3027 = vmatprep.subr.bf16.mxu0 %v3190_v39 }
 0xa90   :  { %3028 = vmatpush3.bf16.msra.mxu0 %v2112_v35 }
 0xa91   :  { %3029 = vmatprep.subr.bf16.mxu0 %v3190_v39 }
 0xa94   :  { %3030 = vmatpush3.bf16.msra.mxu0 %v2111_v9 }
 0xa97   :  { %3032 = vmatmul.mubr.bf16.vlgmr.msra.gmra.mxu0 %v3140_v10 }
 0xb57   :  { %v2159_v13 = vpop.f32.mrf.mxu0 }
 0xb58   :  { %2306 = vst [vmem:[%s3420_s5] sm:$0xff] %v2159_v13 }
 0xb59   :  { %v3033_v16 = vpop.f32.mrf.mxu0 }
 0xb5b   :  { %v2162_v22 = vpop.f32.mrf.mxu0 }
 0xb5c   :  { %v2166_v23 = vpack.c.bf16 %v2162_v22, %v2159_v13  ;;  %2308 = vst [vmem:[%s3420_s5 + $0x10] sm:$0xff] %v2162_v22 }
 0xb5d   :  { %v3034_v24 = vpop.f32.mrf.mxu0 }
 0xb5e   :  { %3052 = vmatmul.mubr.bf16.vlgmr.msra.gmra.mxu1 %v2166_v23 }
 0xc1e   :  { %v2274_v28 = vpop.f32.mrf.mxu1 }
 0xc1f   :  { %v2275_v29 = vadd.f32 %v2412_v27, %v2274_v28 }
 0xc20   :  { %v3053_v36 = vpop.f32.mrf.mxu1 }
 0xc21   :  { %v2284_v37 = vsel %vm2283_vm1, %v2275_v29, -1e+30 }
 0xc22   :  { %2286 = vmax.xlane.f32.xlu0 %v2284_v37  ;;  %v2277_v38 = vpop.f32.mrf.mxu1 }
 0xc23   :  { %v2278_v39 = vadd.f32 %v2412_v27, %v2277_v38 }
 0xc24   :  { %v3054_v40 = vpop.f32.mrf.mxu1 }
 0xc25   :  { %v2285_v41 = vsel %vm2283_vm1, %v2278_v39, -1e+30 }
 0xc26   :  { %2288 = vmax.xlane.f32.xlu0 %v2285_v41 }
 0xcab   :  { %v2287_v42 = vpop.xlane.xlu0 %2286 }
 0xcac   :  { %v2290_v21 = vsub.f32 %v2284_v37, %v2287_v42 }
 0xcae   :  { %v2292_v4 = vmul.f32 1.442695, %v2290_v21 }
 0xcaf   :  { %v2289_v43 = vpop.xlane.xlu0 %2288 }
 0xcb0   :  { %v2291_v44 = vsub.f32 %v2285_v41, %v2289_v43  ;;  %3149 = vpow2.f32 %v2292_v4 }
 0xcb2   :  { %v2294_v45 = vmul.f32 1.442695, %v2291_v44 }
 0xcb4   :  { %3151 = vpow2.f32 %v2294_v45 }
 0xcbd   :  { %v3150_v46 = vpop.eup %3149 }
 0xcbe   :  { %2296 = vadd.xlane.f32.xlu1 %v3150_v46 }
 0xcc1   :  { %v3152_v47 = vpop.eup %3151 }
 0xcc2   :  { %2298 = vadd.xlane.f32.xlu1 %v3152_v47 }
 0xd47   :  { %v2297_v48 = vpop.xlane.xlu1 %2296 }
 0xd48   :  { %3153 = vlog2.f32 %v2297_v48 }
 0xd4b   :  { %v2299_v49 = vpop.xlane.xlu1 %2298 }
 0xd4c   :  { %3155 = vlog2.f32 %v2299_v49 }
 0xd55   :  { %v3154_v50 = vpop.eup %3153 }
 0xd56   :  { %v2301_v51 = vmul.f32 0.6931472, %v3154_v50 }
 0xd58   :  { %v2304_v52 = vsub.f32 %v2290_v21, %v2301_v51 }
 0xd59   :  { %v3156_v53 = vpop.eup %3155 }
 0xd5a   :  { %2307 = vst [vmem:[%s3420_s5 + $0x8] sm:$0xff] %v2304_v52  ;;  %v2303_v54 = vmul.f32 0.6931472, %v3156_v53 }
 0xd5c   :  { %v2305_v55 = vsub.f32 %v2291_v44, %v2303_v54 }
 0xd5e   :  { %2309 = vst [vmem:[%s3420_s5 + $0x18] sm:$0xff] %v2305_v55 }
 0xd5f   :  { %2314 = vsyncpa [#allocation3], 1 }

</bundles_post_ra>
